<compile_context>
chip_gen: v7x
topology: tpu7x:2x2x1
jax: 0.10.0
libtpu: 0.0.40
codegen_flags: <defaults>
</compile_context>

<pallas_src>
import math

import numpy as np
import jax
import jax.numpy as jnp
from jax import lax
from jax.experimental import pallas as pl
from jax.experimental.pallas import tpu as pltpu

# ---------------------------------------------------------------------------
# Synthetic, deterministic stand-ins for the module's external constants.
# TODO(synk): `constants.bg_phi`, `config.PHI_CUT`, `EPS` come from external
#             files in the original repo; defined deterministically here.
# ---------------------------------------------------------------------------
EPS = 1e-4
PHI_CUT = 0.5
N_PHI_BINS = 12
_STEP = 15.0 * math.pi / 180.0
_BIN_CENTERS = (np.arange(N_PHI_BINS) + 0.5) * _STEP
BG_PHI = (np.sin(_BIN_CENTERS) / np.sin(_BIN_CENTERS).sum()).astype(np.float64)

N_KNOTS = 16                  # 12 + 4 knots
N_INTERVALS = N_KNOTS - 1     # 15 cubic pieces
LANE = 128
SUBLANE = 8
STRIP_ROWS = 8                # one (8,128) vreg plane per strip -> small live set even at BT=4
MAX_TILE_ROWS = 256           # hard cap; actual rows sized per-generation from VMEM
MAX_BATCH_BLOCK = 4           # batch elements per grid step (must stay in {4,2,1})

# arccos minimax polynomial (Abramowitz & Stegun 4.4.46), |err| <= 2e-8 rad.
_ACOS_C = (1.5707963050, -0.2145988016, 0.0889789874, -0.0501743046,
           0.0308918810, -0.0170881256, 0.0066700901, -0.0012624911)


# ---------------------------------------------------------------------------
# Glue: natural cubic spline (stand-in for spline.cubic_spline / spline.evaluate).
# TODO(synk): original spline module source unavailable; natural cubic spline assumed.
# ---------------------------------------------------------------------------
def natural_cubic_second_derivs(x, y):
    """x: (n,) knots, y: (..., n) values -> natural-spline 2nd derivatives M: (..., n)."""
    x = np.asarray(x, dtype=np.float64)
    y = np.asarray(y, dtype=np.float64)
    n = x.shape[0]
    h = np.diff(x)
    yf = y.reshape(-1, n)
    A = np.zeros((n - 2, n - 2), dtype=np.float64)
    for i in range(n - 2):
        A[i, i] = 2.0 * (h[i] + h[i + 1])
        if i > 0:
            A[i, i - 1] = h[i]
        if i < n - 3:
            A[i, i + 1] = h[i + 1]
    rhs = 6.0 * ((yf[:, 2:] - yf[:, 1:-1]) / h[1:] - (yf[:, 1:-1] - yf[:, :-2]) / h[:-1])
    m_inner = np.linalg.solve(A, rhs.T).T
    M = np.zeros_like(yf)
    M[:, 1:-1] = m_inner
    return M.reshape(y.shape)


def spline_coeffs_from_ym(x, y, M):
    """Per-interval (a,b,c,d): value at t = x_eval - x[i] is a + b*t + c*t^2 + d*t^3."""
    x = np.asarray(x, dtype=np.float64)
    h = np.diff(x)
    a = y[..., :-1]
    b = (y[..., 1:] - y[..., :-1]) / h - h * (2.0 * M[..., :-1] + M[..., 1:]) / 6.0
    c = M[..., :-1] / 2.0
    d = (M[..., 1:] - M[..., :-1]) / (6.0 * h)
    return np.stack([a, b, c, d], axis=-1)


# ---------------------------------------------------------------------------
# Generation-aware block sizing (feedback: v7x has 64 MiB VMEM/TC vs 128 MiB on v5e/v6e).
# ---------------------------------------------------------------------------
def _vmem_capacity_bytes():
    try:
        return int(pltpu.get_tpu_info().vmem_capacity_bytes)
    except Exception:
        return 64 << 20          # conservative fallback = v7x per-TensorCore VMEM


def _pick_tile_rows(vmem_bytes):
    # Double-buffered working set per 128-pair row:
    #   Y/M spline stream: 2 bufs * 32 f32 * 128 lanes           = 32 KiB
    #   u+v coordinates:   2 bufs * 2*3 f32 * 128 * MAX_BT       = 24 KiB
    per_row = 2 * (2 * N_KNOTS) * LANE * 4 + 2 * (2 * 3) * LANE * 4 * MAX_BATCH_BLOCK
    rows = (vmem_bytes // 3) // per_row
    rows = (rows // SUBLANE) * SUBLANE
    return int(max(SUBLANE, min(MAX_TILE_ROWS, rows)))


# ---------------------------------------------------------------------------
# Pallas kernel: per-pair angle + spline potential, strip-mined, batch-blocked.
# ---------------------------------------------------------------------------
def _make_phi_kernel(n_strips, bt, cut0, knot_step, inv_h, h_over_6, inv_6h):
    inv_step = 1.0 / knot_step

    def kernel(u_ref, v_ref, ym_ref, out_ref):
        # u_ref, v_ref: (bt, 3, n_strips, 8, 128)  per-pair u = CA_i-CB_i, v = CB_j-CB_i
        # ym_ref:       (n_strips, 2, 16, 8, 128)  knot values Y / 2nd derivs M per pair
        # out_ref:      (1, bt, 8, 128)            lane-dense partial sums

        def strip_body(s, accs):
            # ---- per-batch planar angle (trRosetta phi) ----
            # TODO(synk): calc_angle source unavailable; standard planar angle
            #             (CA_i, CB_i, CB_j) with index pass-through is assumed.
            idx_l, t_l = [], []
            for bb in range(bt):
                ux = u_ref[bb, 0, s]
                uy = u_ref[bb, 1, s]
                uz = u_ref[bb, 2, s]
                vx = v_ref[bb, 0, s]
                vy = v_ref[bb, 1, s]
                vz = v_ref[bb, 2, s]

                dot = ux * vx + uy * vy + uz * vz
                nu2 = ux * ux + uy * uy + uz * uz
                nv2 = vx * vx + vy * vy + vz * vz
                inv_norm = lax.rsqrt(nu2 * nv2 + 1e-12)          # EUP
                cosang = jnp.clip(dot * inv_norm, -0.999999, 0.999999)

                # arccos via A&S 4.4.46 minimax polynomial (mul/add/sqrt/select only).
                xa = jnp.abs(cosang)
                p = jnp.full_like(xa, _ACOS_C[7])
                for ck in _ACOS_C[6::-1]:
                    p = p * xa + ck
                acos_pos = jnp.sqrt(1.0 - xa) * p
                phi = jnp.where(cosang >= 0.0, acos_pos, math.pi - acos_pos)

                # Uniform knot spacing -> arithmetic interval index.
                idx = jnp.clip(jnp.floor((phi - cut0) * inv_step).astype(jnp.int32),
                               0, N_INTERVALS - 1)
                t_l.append(phi - (cut0 + idx.astype(jnp.float32) * knot_step))
                idx_l.append(idx)

            # ---- shared knot / 2nd-derivative selection ----
            # Each (8,128) plane is loaded from VMEM once and reused across all bt
            # batch elements; Y(i)/M(i) planes are carried between intervals, so only
            # 32 plane loads per strip (vs 60 with packed a,b,c,d coefficients).
            y_cur = ym_ref[s, 0, 0]
            m_cur = ym_ref[s, 1, 0]
            y_nxt = ym_ref[s, 0, 1]
            m_nxt = ym_ref[s, 1, 1]
            yi = [y_cur] * bt
            yip = [y_nxt] * bt
            mi = [m_cur] * bt
            mip = [m_nxt] * bt
            for i in range(1, N_INTERVALS):
                y_cur, m_cur = y_nxt, m_nxt
                y_nxt = ym_ref[s, 0, i + 1]
                m_nxt = ym_ref[s, 1, i + 1]
                for bb in range(bt):
                    sel = idx_l[bb] == i            # one compare shared by 4 selects
                    yi[bb] = jnp.where(sel, y_cur, yi[bb])
                    yip[bb] = jnp.where(sel, y_nxt, yip[bb])
                    mi[bb] = jnp.where(sel, m_cur, mi[bb])
                    mip[bb] = jnp.where(sel, m_nxt, mip[bb])

            # ---- reconstruct cubic coefficients and evaluate (Horner) ----
            new_accs = []
            for bb in range(bt):
                t = t_l[bb]
                a = yi[bb]
                c = 0.5 * mi[bb]
                d = inv_6h * (mip[bb] - mi[bb])
                b = inv_h * (yip[bb] - yi[bb]) - h_over_6 * (2.0 * mi[bb] + mip[bb])
                val = a + t * (b + t * (c + t * d))   # 0 on padded pairs (Y = M = 0)
                new_accs.append(accs[bb] + val)
            return tuple(new_accs)

        accs0 = tuple(jnp.zeros((SUBLANE, LANE), jnp.float32) for _ in range(bt))
        accs = lax.fori_loop(0, n_strips, strip_body, accs0)
        for bb in range(bt):
            out_ref[0, bb] = accs[bb]

    return kernel


# ---------------------------------------------------------------------------
# Module wrapper (static packing once; device-side gather + pallas_call per forward).
# ---------------------------------------------------------------------------
class PhiRestraintPallas:
    def __init__(self, pred_phi):
        pred_phi = np.asarray(pred_phi, dtype=np.float32)        # (L, L, 13)
        step = 15.0 * math.pi / 180.0
        self.cutoffs = np.linspace(-1.5 * step, math.pi + 1.5 * step, N_KNOTS).astype(np.float32)

        _x = self.cutoffs.astype(np.float64)
        _ref = -np.log(BG_PHI)                                   # (12,)
        _y = -np.log(pred_phi[:, :, :-1].astype(np.float64) + EPS) - _ref
        _y = np.concatenate(
            [np.flip(_y[:, :, :2], axis=-1), _y, np.flip(_y[:, :, -2:], axis=-1)], axis=-1)
        m2 = natural_cubic_second_derivs(_x, _y)                 # (L, L, 16)
        self.coeff = spline_coeffs_from_ym(_x, _y, m2).astype(np.float32)   # (L,L,15,4) for ref

        L = pred_phi.shape[0]
        _filter = pred_phi[:, :, -1] < PHI_CUT
        self.mask = (np.eye(L) == 0) & _filter                   # (L, L) bool

        self.cut0 = float(self.cutoffs[0])
        self.knot_step = float((_x[-1] - _x[0]) / float(N_INTERVALS))

        x_idx, y_idx = np.where(self.mask)
        self.n_pairs = N = int(x_idx.shape[0])
        if N == 0:
            self._forward_fn = None
            return

        # ---- generation-aware block sizing ----
        vmem_bytes = _vmem_capacity_bytes()
        max_rows = _pick_tile_rows(vmem_bytes)
        self.vmem_limit_bytes = int(min(vmem_bytes // 2, 64 << 20))

        rows_needed = -(-N // LANE)                              # ceil(N / 128)
        rows_needed = -(-rows_needed // SUBLANE) * SUBLANE       # round up to sublane mult
        if rows_needed <= max_rows:
            self.tile_rows = rows_needed
            self.num_tiles = 1
        else:
            self.tile_rows = max_rows
            self.num_tiles = -(-rows_needed // max_rows)
        self.n_strips = self.tile_rows // STRIP_ROWS
        P = self.padded_pairs = self.num_tiles * self.tile_rows * LANE
        blocks = self.num_tiles * self.n_strips

        # ---- pack per-pair spline data ONCE: Y[16] + M[16] (32 f32/pair) ----
        ym = np.zeros((P, 2, N_KNOTS), np.float32)
        ym[:N, 0] = _y[x_idx, y_idx]
        ym[:N, 1] = m2[x_idx, y_idx]
        ym = ym.reshape(blocks, STRIP_ROWS, LANE, 2, N_KNOTS)
        ym = np.ascontiguousarray(ym.transpose(0, 3, 4, 1, 2))   # (blocks, 2, 16, 8, 128)
        self.ym_dev = jnp.asarray(ym)

        xi = np.zeros((P,), np.int32)
        yi = np.zeros((P,), np.int32)
        xi[:N] = x_idx
        yi[:N] = y_idx                                           # padding -> index 0 (Y=M=0)
        self.x_idx_dev = jnp.asarray(xi.reshape(blocks, STRIP_ROWS, LANE))
        self.y_idx_dev = jnp.asarray(yi.reshape(blocks, STRIP_ROWS, LANE))

        self._forward_fn = jax.jit(self._build_forward())

    def __str__(self):
        return "Phi constraints: %i" % int(np.sum(self.mask))

    def _build_forward(self):
        num_tiles = self.num_tiles
        n_strips = self.n_strips
        P = self.padded_pairs
        cut0, knot_step = self.cut0, self.knot_step
        inv_h = 1.0 / knot_step
        h_over_6 = knot_step / 6.0
        inv_6h = 1.0 / (6.0 * knot_step)
        vmem_limit = self.vmem_limit_bytes

        def fwd(CA, CB, ym_packed, x_idx, y_idx):
            B = CA.shape[0]
            bt = next(d for d in (MAX_BATCH_BLOCK, 2, 1) if B % d == 0)

            # Gather straight into the kernel layout: no pad/concat/minor-dim transpose
            # of the big per-pair stream — only the tiny (B, L, 3) arrays are transposed.
            CAt = jnp.swapaxes(CA, 1, 2)                          # (B, 3, L)
            CBt = jnp.swapaxes(CB, 1, 2)
            x_ca = jnp.take(CAt, x_idx, axis=2)                   # (B, 3, blocks, 8, 128)
            x_cb = jnp.take(CBt, x_idx, axis=2)
            y_cb = jnp.take(CBt, y_idx, axis=2)
            u = x_ca - x_cb
            v = y_cb - x_cb

            kernel = _make_phi_kernel(n_strips, bt, cut0, knot_step,
                                      inv_h, h_over_6, inv_6h)

            cost = pl.CostEstimate(
                flops=int(120 * B * P),
                transcendentals=int(2 * B * P),
                bytes_accessed=int(4 * (int(ym_packed.size) + int(u.size) + int(v.size)
                                        + num_tiles * B * SUBLANE * LANE)))

            partials = pl.pallas_call(
                kernel,
                out_shape=jax.ShapeDtypeStruct((num_tiles, B, SUBLANE, LANE), jnp.float32),
                grid=(num_tiles, B // bt),
                in_specs=[
                    pl.BlockSpec((bt, 3, n_strips, STRIP_ROWS, LANE),
                                 lambda t, b: (b, 0, t, 0, 0)),
                    pl.BlockSpec((bt, 3, n_strips, STRIP_ROWS, LANE),
                                 lambda t, b: (b, 0, t, 0, 0)),
                    # spline stream: depends only on the tile axis -> DMA'd once per tile,
                    # reused across the batch axis.
                    pl.BlockSpec((n_strips, 2, N_KNOTS, STRIP_ROWS, LANE),
                                 lambda t, b: (t, 0, 0, 0, 0)),
                ],
                out_specs=pl.BlockSpec((1, bt, SUBLANE, LANE),
                                       lambda t, b: (t, b, 0, 0)),
                compiler_params=pltpu.CompilerParams(
                    dimension_semantics=("parallel", "parallel"),
                    vmem_limit_bytes=vmem_limit),
                cost_estimate=cost,
            )(u, v, ym_packed)

            return jnp.sum(partials)                              # pairwise_phi potential

        return fwd

    def forward(self, CA, CB):
        """CA, CB: (B, L, 3) float32 coordinate arrays (coord.CA / coord.CB)."""
        if self.n_pairs == 0:
            return {"pairwise_phi": jnp.float32(0.0)}
        CA = jnp.asarray(CA, jnp.float32)
        CB = jnp.asarray(CB, jnp.float32)
        total = self._forward_fn(CA, CB, self.ym_dev, self.x_idx_dev, self.y_idx_dev)
        return {"pairwise_phi": total}


# ---------------------------------------------------------------------------
# Pure-NumPy reference (float64) for verification.
# ---------------------------------------------------------------------------
def reference_forward(module, CA, CB):
    x_idx, y_idx = np.where(module.mask)
    if x_idx.shape[0] == 0:
        return 0.0
    B = CA.shape[0]
    x_CA = CA[:, x_idx].reshape(-1, 3).astype(np.float64)
    x_CB = CB[:, x_idx].reshape(-1, 3).astype(np.float64)
    y_CB = CB[:, y_idx].reshape(-1, 3).astype(np.float64)
    u = x_CA - x_CB
    v = y_CB - x_CB
    cos = np.clip(
        (u * v).sum(-1) / (np.linalg.norm(u, axis=-1) * np.linalg.norm(v, axis=-1) + 1e-12),
        -0.999999, 0.999999)
    phi = np.arccos(cos)
    coeff = np.tile(module.coeff[x_idx, y_idx], (B, 1, 1)).astype(np.float64)   # (B*N,15,4)
    cut = module.cutoffs.astype(np.float64)
    idx = np.clip(np.searchsorted(cut, phi, side="right") - 1, 0, N_INTERVALS - 1)
    t = phi - cut[idx]
    rows = np.arange(phi.shape[0])
    a, b, c, d = (coeff[rows, idx, j] for j in range(4))
    return float(np.sum(a + t * (b + t * (c + t * d))))


if __name__ == "__main__":
    key = jax.random.PRNGKey(0)
    B, L = 2, 8
    k1, k2, k3 = jax.random.split(key, 3)

    # pred_phi: (L, L, 13) probabilities (12 angle bins + "no contact" bin)
    logits = jax.random.normal(k1, (L, L, N_PHI_BINS + 1), dtype=jnp.float32)
    pred_phi = np.asarray(jax.nn.softmax(logits, axis=-1), dtype=np.float32)

    # coord.CA / coord.CB: (B, L, 3)
    CA = np.asarray(jax.random.normal(k2, (B, L, 3), dtype=jnp.float32) * 4.0, dtype=np.float32)
    CB = np.asarray(jax.random.normal(k3, (B, L, 3), dtype=jnp.float32) * 4.0, dtype=np.float32)

    model = PhiRestraintPallas(pred_phi)
    out = model.forward(CA, CB)
    val = float(jax.block_until_ready(out["pairwise_phi"]))

    ref = reference_forward(model, CA, CB)
    assert np.isfinite(val), "kernel produced non-finite output"
    assert abs(val - ref) <= 5e-2 + 2e-3 * abs(ref), (val, ref)
    print("KERNEL_OK")
</pallas_src>

<mosaic_0001>
module attributes {stable_mosaic.version = 11 : i64} {
  func.func @kernel(%arg0: i32, %arg1: i32, %arg2: memref<2x3x1x8x128xf32, #tpu.memory_space<vmem>>, %arg3: memref<2x3x1x8x128xf32, #tpu.memory_space<vmem>>, %arg4: memref<1x2x16x8x128xf32, #tpu.memory_space<vmem>>, %arg5: memref<1x2x8x128xf32, #tpu.memory_space<vmem>>) attributes {dimension_semantics = [#tpu.dimension_semantics<parallel>, #tpu.dimension_semantics<parallel>], iteration_bounds = array<i64: 1, 1>, scalar_prefetch = 0 : i64, scratch_operands = 0 : i64, tpu.core_type = #tpu.core_type<tc>, window_params = [{transform_indices = @transform_0, window_bounds = array<i64: 2, 3, 1, 8, 128>}, {transform_indices = @transform_1, window_bounds = array<i64: 2, 3, 1, 8, 128>}, {transform_indices = @transform_2, window_bounds = array<i64: 1, 2, 16, 8, 128>}, {transform_indices = @transform_3, window_bounds = array<i64: 1, 2, 8, 128>}]} {
    %cst = arith.constant 0.000000e+00 : f32
    %0 = vector.broadcast %cst : f32 to vector<8x128xf32>
    %cst_0 = arith.constant 0.000000e+00 : f32
    %1 = vector.broadcast %cst_0 : f32 to vector<8x128xf32>
    %c0_i32 = arith.constant 0 : i32
    %c0 = arith.constant 0 : index
    %c0_1 = arith.constant 0 : index
    %2 = arith.index_cast %c0_i32 : i32 to index
    %c0_2 = arith.constant 0 : index
    %c0_3 = arith.constant 0 : index
    %3 = vector.load %arg2[%c0, %c0_1, %2, %c0_2, %c0_3] : memref<2x3x1x8x128xf32, #tpu.memory_space<vmem>>, vector<1x1x1x8x128xf32>
    %4 = vector.shape_cast %3 : vector<1x1x1x8x128xf32> to vector<8x128xf32>
    %c0_4 = arith.constant 0 : index
    %c1 = arith.constant 1 : index
    %5 = arith.index_cast %c0_i32 : i32 to index
    %c0_5 = arith.constant 0 : index
    %c0_6 = arith.constant 0 : index
    %6 = vector.load %arg2[%c0_4, %c1, %5, %c0_5, %c0_6] : memref<2x3x1x8x128xf32, #tpu.memory_space<vmem>>, vector<1x1x1x8x128xf32>
    %7 = vector.shape_cast %6 : vector<1x1x1x8x128xf32> to vector<8x128xf32>
    %c0_7 = arith.constant 0 : index
    %c2 = arith.constant 2 : index
    %8 = arith.index_cast %c0_i32 : i32 to index
    %c0_8 = arith.constant 0 : index
    %c0_9 = arith.constant 0 : index
    %9 = vector.load %arg2[%c0_7, %c2, %8, %c0_8, %c0_9] : memref<2x3x1x8x128xf32, #tpu.memory_space<vmem>>, vector<1x1x1x8x128xf32>
    %10 = vector.shape_cast %9 : vector<1x1x1x8x128xf32> to vector<8x128xf32>
    %c0_10 = arith.constant 0 : index
    %c0_11 = arith.constant 0 : index
    %11 = arith.index_cast %c0_i32 : i32 to index
    %c0_12 = arith.constant 0 : index
    %c0_13 = arith.constant 0 : index
    %12 = vector.load %arg3[%c0_10, %c0_11, %11, %c0_12, %c0_13] : memref<2x3x1x8x128xf32, #tpu.memory_space<vmem>>, vector<1x1x1x8x128xf32>
    %13 = vector.shape_cast %12 : vector<1x1x1x8x128xf32> to vector<8x128xf32>
    %c0_14 = arith.constant 0 : index
    %c1_15 = arith.constant 1 : index
    %14 = arith.index_cast %c0_i32 : i32 to index
    %c0_16 = arith.constant 0 : index
    %c0_17 = arith.constant 0 : index
    %15 = vector.load %arg3[%c0_14, %c1_15, %14, %c0_16, %c0_17] : memref<2x3x1x8x128xf32, #tpu.memory_space<vmem>>, vector<1x1x1x8x128xf32>
    %16 = vector.shape_cast %15 : vector<1x1x1x8x128xf32> to vector<8x128xf32>
    %c0_18 = arith.constant 0 : index
    %c2_19 = arith.constant 2 : index
    %17 = arith.index_cast %c0_i32 : i32 to index
    %c0_20 = arith.constant 0 : index
    %c0_21 = arith.constant 0 : index
    %18 = vector.load %arg3[%c0_18, %c2_19, %17, %c0_20, %c0_21] : memref<2x3x1x8x128xf32, #tpu.memory_space<vmem>>, vector<1x1x1x8x128xf32>
    %19 = vector.shape_cast %18 : vector<1x1x1x8x128xf32> to vector<8x128xf32>
    %20 = arith.mulf %4, %13 : vector<8x128xf32>
    %21 = arith.mulf %7, %16 : vector<8x128xf32>
    %22 = arith.addf %20, %21 : vector<8x128xf32>
    %23 = arith.mulf %10, %19 : vector<8x128xf32>
    %24 = arith.addf %22, %23 : vector<8x128xf32>
    %25 = arith.mulf %4, %4 : vector<8x128xf32>
    %26 = arith.mulf %7, %7 : vector<8x128xf32>
    %27 = arith.addf %25, %26 : vector<8x128xf32>
    %28 = arith.mulf %10, %10 : vector<8x128xf32>
    %29 = arith.addf %27, %28 : vector<8x128xf32>
    %30 = arith.mulf %13, %13 : vector<8x128xf32>
    %31 = arith.mulf %16, %16 : vector<8x128xf32>
    %32 = arith.addf %30, %31 : vector<8x128xf32>
    %33 = arith.mulf %19, %19 : vector<8x128xf32>
    %34 = arith.addf %32, %33 : vector<8x128xf32>
    %35 = arith.mulf %29, %34 : vector<8x128xf32>
    %cst_22 = arith.constant 9.99999996E-13 : f32
    %36 = vector.broadcast %cst_22 : f32 to vector<8x128xf32>
    %37 = arith.addf %35, %36 : vector<8x128xf32>
    %38 = math.rsqrt %37 : vector<8x128xf32>
    %39 = arith.mulf %24, %38 : vector<8x128xf32>
    %cst_23 = arith.constant -0.999998986 : f32
    %cst_24 = arith.constant 0.999998986 : f32
    %40 = vector.broadcast %cst_23 : f32 to vector<8x128xf32>
    %41 = arith.maximumf %40, %39 : vector<8x128xf32>
    %42 = vector.broadcast %cst_24 : f32 to vector<8x128xf32>
    %43 = arith.minimumf %42, %41 : vector<8x128xf32>
    %44 = math.absf %43 : vector<8x128xf32>
    %cst_25 = arith.constant -0.0012624911 : f32
    %45 = vector.broadcast %cst_25 : f32 to vector<8x128xf32>
    %46 = arith.mulf %45, %44 : vector<8x128xf32>
    %cst_26 = arith.constant 6.670090e-03 : f32
    %47 = vector.broadcast %cst_26 : f32 to vector<8x128xf32>
    %48 = arith.addf %46, %47 : vector<8x128xf32>
    %49 = arith.mulf %48, %44 : vector<8x128xf32>
    %cst_27 = arith.constant -0.0170881264 : f32
    %50 = vector.broadcast %cst_27 : f32 to vector<8x128xf32>
    %51 = arith.addf %49, %50 : vector<8x128xf32>
    %52 = arith.mulf %51, %44 : vector<8x128xf32>
    %cst_28 = arith.constant 0.0308918804 : f32
    %53 = vector.broadcast %cst_28 : f32 to vector<8x128xf32>
    %54 = arith.addf %52, %53 : vector<8x128xf32>
    %55 = arith.mulf %54, %44 : vector<8x128xf32>
    %cst_29 = arith.constant -0.0501743034 : f32
    %56 = vector.broadcast %cst_29 : f32 to vector<8x128xf32>
    %57 = arith.addf %55, %56 : vector<8x128xf32>
    %58 = arith.mulf %57, %44 : vector<8x128xf32>
    %cst_30 = arith.constant 0.0889789909 : f32
    %59 = vector.broadcast %cst_30 : f32 to vector<8x128xf32>
    %60 = arith.addf %58, %59 : vector<8x128xf32>
    %61 = arith.mulf %60, %44 : vector<8x128xf32>
    %cst_31 = arith.constant -0.214598805 : f32
    %62 = vector.broadcast %cst_31 : f32 to vector<8x128xf32>
    %63 = arith.addf %61, %62 : vector<8x128xf32>
    %64 = arith.mulf %63, %44 : vector<8x128xf32>
    %cst_32 = arith.constant 1.57079625 : f32
    %65 = vector.broadcast %cst_32 : f32 to vector<8x128xf32>
    %66 = arith.addf %64, %65 : vector<8x128xf32>
    %cst_33 = arith.constant 1.000000e+00 : f32
    %67 = vector.broadcast %cst_33 : f32 to vector<8x128xf32>
    %68 = arith.subf %67, %44 : vector<8x128xf32>
    %69 = math.sqrt %68 : vector<8x128xf32>
    %70 = arith.mulf %69, %66 : vector<8x128xf32>
    %cst_34 = arith.constant 0.000000e+00 : f32
    %71 = vector.broadcast %cst_34 : f32 to vector<8x128xf32>
    %72 = arith.cmpf oge, %43, %71 : vector<8x128xf32>
    %cst_35 = arith.constant 3.14159274 : f32
    %73 = vector.broadcast %cst_35 : f32 to vector<8x128xf32>
    %74 = arith.subf %73, %70 : vector<8x128xf32>
    %75 = arith.select %72, %70, %74 : vector<8x128xi1>, vector<8x128xf32>
    %cst_36 = arith.constant -0.392699093 : f32
    %76 = vector.broadcast %cst_36 : f32 to vector<8x128xf32>
    %77 = arith.subf %75, %76 : vector<8x128xf32>
    %cst_37 = arith.constant 3.8197186 : f32
    %78 = vector.broadcast %cst_37 : f32 to vector<8x128xf32>
    %79 = arith.mulf %77, %78 : vector<8x128xf32>
    %80 = math.floor %79 : vector<8x128xf32>
    %81 = arith.fptosi %80 : vector<8x128xf32> to vector<8x128xi32>
    %c0_i32_38 = arith.constant 0 : i32
    %c14_i32 = arith.constant 14 : i32
    %82 = vector.broadcast %c0_i32_38 : i32 to vector<8x128xi32>
    %83 = arith.maxsi %82, %81 : vector<8x128xi32>
    %84 = vector.broadcast %c14_i32 : i32 to vector<8x128xi32>
    %85 = arith.minsi %84, %83 : vector<8x128xi32>
    %86 = arith.sitofp %85 : vector<8x128xi32> to vector<8x128xf32>
    %cst_39 = arith.constant 0.261799395 : f32
    %87 = vector.broadcast %cst_39 : f32 to vector<8x128xf32>
    %88 = arith.mulf %86, %87 : vector<8x128xf32>
    %cst_40 = arith.constant -0.392699093 : f32
    %89 = vector.broadcast %cst_40 : f32 to vector<8x128xf32>
    %90 = arith.addf %89, %88 : vector<8x128xf32>
    %91 = arith.subf %75, %90 : vector<8x128xf32>
    %c1_41 = arith.constant 1 : index
    %c0_42 = arith.constant 0 : index
    %92 = arith.index_cast %c0_i32 : i32 to index
    %c0_43 = arith.constant 0 : index
    %c0_44 = arith.constant 0 : index
    %93 = vector.load %arg2[%c1_41, %c0_42, %92, %c0_43, %c0_44] : memref<2x3x1x8x128xf32, #tpu.memory_space<vmem>>, vector<1x1x1x8x128xf32>
    %94 = vector.shape_cast %93 : vector<1x1x1x8x128xf32> to vector<8x128xf32>
    %c1_45 = arith.constant 1 : index
    %c1_46 = arith.constant 1 : index
    %95 = arith.index_cast %c0_i32 : i32 to index
    %c0_47 = arith.constant 0 : index
    %c0_48 = arith.constant 0 : index
    %96 = vector.load %arg2[%c1_45, %c1_46, %95, %c0_47, %c0_48] : memref<2x3x1x8x128xf32, #tpu.memory_space<vmem>>, vector<1x1x1x8x128xf32>
    %97 = vector.shape_cast %96 : vector<1x1x1x8x128xf32> to vector<8x128xf32>
    %c1_49 = arith.constant 1 : index
    %c2_50 = arith.constant 2 : index
    %98 = arith.index_cast %c0_i32 : i32 to index
    %c0_51 = arith.constant 0 : index
    %c0_52 = arith.constant 0 : index
    %99 = vector.load %arg2[%c1_49, %c2_50, %98, %c0_51, %c0_52] : memref<2x3x1x8x128xf32, #tpu.memory_space<vmem>>, vector<1x1x1x8x128xf32>
    %100 = vector.shape_cast %99 : vector<1x1x1x8x128xf32> to vector<8x128xf32>
    %c1_53 = arith.constant 1 : index
    %c0_54 = arith.constant 0 : index
    %101 = arith.index_cast %c0_i32 : i32 to index
    %c0_55 = arith.constant 0 : index
    %c0_56 = arith.constant 0 : index
    %102 = vector.load %arg3[%c1_53, %c0_54, %101, %c0_55, %c0_56] : memref<2x3x1x8x128xf32, #tpu.memory_space<vmem>>, vector<1x1x1x8x128xf32>
    %103 = vector.shape_cast %102 : vector<1x1x1x8x128xf32> to vector<8x128xf32>
    %c1_57 = arith.constant 1 : index
    %c1_58 = arith.constant 1 : index
    %104 = arith.index_cast %c0_i32 : i32 to index
    %c0_59 = arith.constant 0 : index
    %c0_60 = arith.constant 0 : index
    %105 = vector.load %arg3[%c1_57, %c1_58, %104, %c0_59, %c0_60] : memref<2x3x1x8x128xf32, #tpu.memory_space<vmem>>, vector<1x1x1x8x128xf32>
    %106 = vector.shape_cast %105 : vector<1x1x1x8x128xf32> to vector<8x128xf32>
    %c1_61 = arith.constant 1 : index
    %c2_62 = arith.constant 2 : index
    %107 = arith.index_cast %c0_i32 : i32 to index
    %c0_63 = arith.constant 0 : index
    %c0_64 = arith.constant 0 : index
    %108 = vector.load %arg3[%c1_61, %c2_62, %107, %c0_63, %c0_64] : memref<2x3x1x8x128xf32, #tpu.memory_space<vmem>>, vector<1x1x1x8x128xf32>
    %109 = vector.shape_cast %108 : vector<1x1x1x8x128xf32> to vector<8x128xf32>
    %110 = arith.mulf %94, %103 : vector<8x128xf32>
    %111 = arith.mulf %97, %106 : vector<8x128xf32>
    %112 = arith.addf %110, %111 : vector<8x128xf32>
    %113 = arith.mulf %100, %109 : vector<8x128xf32>
    %114 = arith.addf %112, %113 : vector<8x128xf32>
    %115 = arith.mulf %94, %94 : vector<8x128xf32>
    %116 = arith.mulf %97, %97 : vector<8x128xf32>
    %117 = arith.addf %115, %116 : vector<8x128xf32>
    %118 = arith.mulf %100, %100 : vector<8x128xf32>
    %119 = arith.addf %117, %118 : vector<8x128xf32>
    %120 = arith.mulf %103, %103 : vector<8x128xf32>
    %121 = arith.mulf %106, %106 : vector<8x128xf32>
    %122 = arith.addf %120, %121 : vector<8x128xf32>
    %123 = arith.mulf %109, %109 : vector<8x128xf32>
    %124 = arith.addf %122, %123 : vector<8x128xf32>
    %125 = arith.mulf %119, %124 : vector<8x128xf32>
    %cst_65 = arith.constant 9.99999996E-13 : f32
    %126 = vector.broadcast %cst_65 : f32 to vector<8x128xf32>
    %127 = arith.addf %125, %126 : vector<8x128xf32>
    %128 = math.rsqrt %127 : vector<8x128xf32>
    %129 = arith.mulf %114, %128 : vector<8x128xf32>
    %cst_66 = arith.constant -0.999998986 : f32
    %cst_67 = arith.constant 0.999998986 : f32
    %130 = vector.broadcast %cst_66 : f32 to vector<8x128xf32>
    %131 = arith.maximumf %130, %129 : vector<8x128xf32>
    %132 = vector.broadcast %cst_67 : f32 to vector<8x128xf32>
    %133 = arith.minimumf %132, %131 : vector<8x128xf32>
    %134 = math.absf %133 : vector<8x128xf32>
    %cst_68 = arith.constant -0.0012624911 : f32
    %135 = vector.broadcast %cst_68 : f32 to vector<8x128xf32>
    %136 = arith.mulf %135, %134 : vector<8x128xf32>
    %cst_69 = arith.constant 6.670090e-03 : f32
    %137 = vector.broadcast %cst_69 : f32 to vector<8x128xf32>
    %138 = arith.addf %136, %137 : vector<8x128xf32>
    %139 = arith.mulf %138, %134 : vector<8x128xf32>
    %cst_70 = arith.constant -0.0170881264 : f32
    %140 = vector.broadcast %cst_70 : f32 to vector<8x128xf32>
    %141 = arith.addf %139, %140 : vector<8x128xf32>
    %142 = arith.mulf %141, %134 : vector<8x128xf32>
    %cst_71 = arith.constant 0.0308918804 : f32
    %143 = vector.broadcast %cst_71 : f32 to vector<8x128xf32>
    %144 = arith.addf %142, %143 : vector<8x128xf32>
    %145 = arith.mulf %144, %134 : vector<8x128xf32>
    %cst_72 = arith.constant -0.0501743034 : f32
    %146 = vector.broadcast %cst_72 : f32 to vector<8x128xf32>
    %147 = arith.addf %145, %146 : vector<8x128xf32>
    %148 = arith.mulf %147, %134 : vector<8x128xf32>
    %cst_73 = arith.constant 0.0889789909 : f32
    %149 = vector.broadcast %cst_73 : f32 to vector<8x128xf32>
    %150 = arith.addf %148, %149 : vector<8x128xf32>
    %151 = arith.mulf %150, %134 : vector<8x128xf32>
    %cst_74 = arith.constant -0.214598805 : f32
    %152 = vector.broadcast %cst_74 : f32 to vector<8x128xf32>
    %153 = arith.addf %151, %152 : vector<8x128xf32>
    %154 = arith.mulf %153, %134 : vector<8x128xf32>
    %cst_75 = arith.constant 1.57079625 : f32
    %155 = vector.broadcast %cst_75 : f32 to vector<8x128xf32>
    %156 = arith.addf %154, %155 : vector<8x128xf32>
    %cst_76 = arith.constant 1.000000e+00 : f32
    %157 = vector.broadcast %cst_76 : f32 to vector<8x128xf32>
    %158 = arith.subf %157, %134 : vector<8x128xf32>
    %159 = math.sqrt %158 : vector<8x128xf32>
    %160 = arith.mulf %159, %156 : vector<8x128xf32>
    %cst_77 = arith.constant 0.000000e+00 : f32
    %161 = vector.broadcast %cst_77 : f32 to vector<8x128xf32>
    %162 = arith.cmpf oge, %133, %161 : vector<8x128xf32>
    %cst_78 = arith.constant 3.14159274 : f32
    %163 = vector.broadcast %cst_78 : f32 to vector<8x128xf32>
    %164 = arith.subf %163, %160 : vector<8x128xf32>
    %165 = arith.select %162, %160, %164 : vector<8x128xi1>, vector<8x128xf32>
    %cst_79 = arith.constant -0.392699093 : f32
    %166 = vector.broadcast %cst_79 : f32 to vector<8x128xf32>
    %167 = arith.subf %165, %166 : vector<8x128xf32>
    %cst_80 = arith.constant 3.8197186 : f32
    %168 = vector.broadcast %cst_80 : f32 to vector<8x128xf32>
    %169 = arith.mulf %167, %168 : vector<8x128xf32>
    %170 = math.floor %169 : vector<8x128xf32>
    %171 = arith.fptosi %170 : vector<8x128xf32> to vector<8x128xi32>
    %c0_i32_81 = arith.constant 0 : i32
    %c14_i32_82 = arith.constant 14 : i32
    %172 = vector.broadcast %c0_i32_81 : i32 to vector<8x128xi32>
    %173 = arith.maxsi %172, %171 : vector<8x128xi32>
    %174 = vector.broadcast %c14_i32_82 : i32 to vector<8x128xi32>
    %175 = arith.minsi %174, %173 : vector<8x128xi32>
    %176 = arith.sitofp %175 : vector<8x128xi32> to vector<8x128xf32>
    %cst_83 = arith.constant 0.261799395 : f32
    %177 = vector.broadcast %cst_83 : f32 to vector<8x128xf32>
    %178 = arith.mulf %176, %177 : vector<8x128xf32>
    %cst_84 = arith.constant -0.392699093 : f32
    %179 = vector.broadcast %cst_84 : f32 to vector<8x128xf32>
    %180 = arith.addf %179, %178 : vector<8x128xf32>
    %181 = arith.subf %165, %180 : vector<8x128xf32>
    %182 = arith.index_cast %c0_i32 : i32 to index
    %c0_85 = arith.constant 0 : index
    %c0_86 = arith.constant 0 : index
    %c0_87 = arith.constant 0 : index
    %c0_88 = arith.constant 0 : index
    %183 = vector.load %arg4[%182, %c0_85, %c0_86, %c0_87, %c0_88] : memref<1x2x16x8x128xf32, #tpu.memory_space<vmem>>, vector<1x1x1x8x128xf32>
    %184 = vector.shape_cast %183 : vector<1x1x1x8x128xf32> to vector<8x128xf32>
    %185 = arith.index_cast %c0_i32 : i32 to index
    %c1_89 = arith.constant 1 : index
    %c0_90 = arith.constant 0 : index
    %c0_91 = arith.constant 0 : index
    %c0_92 = arith.constant 0 : index
    %186 = vector.load %arg4[%185, %c1_89, %c0_90, %c0_91, %c0_92] : memref<1x2x16x8x128xf32, #tpu.memory_space<vmem>>, vector<1x1x1x8x128xf32>
    %187 = vector.shape_cast %186 : vector<1x1x1x8x128xf32> to vector<8x128xf32>
    %188 = arith.index_cast %c0_i32 : i32 to index
    %c0_93 = arith.constant 0 : index
    %c1_94 = arith.constant 1 : index
    %c0_95 = arith.constant 0 : index
    %c0_96 = arith.constant 0 : index
    %189 = vector.load %arg4[%188, %c0_93, %c1_94, %c0_95, %c0_96] : memref<1x2x16x8x128xf32, #tpu.memory_space<vmem>>, vector<1x1x1x8x128xf32>
    %190 = vector.shape_cast %189 : vector<1x1x1x8x128xf32> to vector<8x128xf32>
    %191 = arith.index_cast %c0_i32 : i32 to index
    %c1_97 = arith.constant 1 : index
    %c1_98 = arith.constant 1 : index
    %c0_99 = arith.constant 0 : index
    %c0_100 = arith.constant 0 : index
    %192 = vector.load %arg4[%191, %c1_97, %c1_98, %c0_99, %c0_100] : memref<1x2x16x8x128xf32, #tpu.memory_space<vmem>>, vector<1x1x1x8x128xf32>
    %193 = vector.shape_cast %192 : vector<1x1x1x8x128xf32> to vector<8x128xf32>
    %194 = arith.index_cast %c0_i32 : i32 to index
    %c0_101 = arith.constant 0 : index
    %c2_102 = arith.constant 2 : index
    %c0_103 = arith.constant 0 : index
    %c0_104 = arith.constant 0 : index
    %195 = vector.load %arg4[%194, %c0_101, %c2_102, %c0_103, %c0_104] : memref<1x2x16x8x128xf32, #tpu.memory_space<vmem>>, vector<1x1x1x8x128xf32>
    %196 = vector.shape_cast %195 : vector<1x1x1x8x128xf32> to vector<8x128xf32>
    %197 = arith.index_cast %c0_i32 : i32 to index
    %c1_105 = arith.constant 1 : index
    %c2_106 = arith.constant 2 : index
    %c0_107 = arith.constant 0 : index
    %c0_108 = arith.constant 0 : index
    %198 = vector.load %arg4[%197, %c1_105, %c2_106, %c0_107, %c0_108] : memref<1x2x16x8x128xf32, #tpu.memory_space<vmem>>, vector<1x1x1x8x128xf32>
    %199 = vector.shape_cast %198 : vector<1x1x1x8x128xf32> to vector<8x128xf32>
    %c1_i32 = arith.constant 1 : i32
    %200 = vector.broadcast %c1_i32 : i32 to vector<8x128xi32>
    %201 = arith.cmpi eq, %85, %200 : vector<8x128xi32>
    %202 = arith.select %201, %190, %184 : vector<8x128xi1>, vector<8x128xf32>
    %203 = arith.select %201, %196, %190 : vector<8x128xi1>, vector<8x128xf32>
    %204 = arith.select %201, %193, %187 : vector<8x128xi1>, vector<8x128xf32>
    %205 = arith.select %201, %199, %193 : vector<8x128xi1>, vector<8x128xf32>
    %c1_i32_109 = arith.constant 1 : i32
    %206 = vector.broadcast %c1_i32_109 : i32 to vector<8x128xi32>
    %207 = arith.cmpi eq, %175, %206 : vector<8x128xi32>
    %208 = arith.select %207, %190, %184 : vector<8x128xi1>, vector<8x128xf32>
    %209 = arith.select %207, %196, %190 : vector<8x128xi1>, vector<8x128xf32>
    %210 = arith.select %207, %193, %187 : vector<8x128xi1>, vector<8x128xf32>
    %211 = arith.select %207, %199, %193 : vector<8x128xi1>, vector<8x128xf32>
    %212 = arith.index_cast %c0_i32 : i32 to index
    %c0_110 = arith.constant 0 : index
    %c3 = arith.constant 3 : index
    %c0_111 = arith.constant 0 : index
    %c0_112 = arith.constant 0 : index
    %213 = vector.load %arg4[%212, %c0_110, %c3, %c0_111, %c0_112] : memref<1x2x16x8x128xf32, #tpu.memory_space<vmem>>, vector<1x1x1x8x128xf32>
    %214 = vector.shape_cast %213 : vector<1x1x1x8x128xf32> to vector<8x128xf32>
    %215 = arith.index_cast %c0_i32 : i32 to index
    %c1_113 = arith.constant 1 : index
    %c3_114 = arith.constant 3 : index
    %c0_115 = arith.constant 0 : index
    %c0_116 = arith.constant 0 : index
    %216 = vector.load %arg4[%215, %c1_113, %c3_114, %c0_115, %c0_116] : memref<1x2x16x8x128xf32, #tpu.memory_space<vmem>>, vector<1x1x1x8x128xf32>
    %217 = vector.shape_cast %216 : vector<1x1x1x8x128xf32> to vector<8x128xf32>
    %c2_i32 = arith.constant 2 : i32
    %218 = vector.broadcast %c2_i32 : i32 to vector<8x128xi32>
    %219 = arith.cmpi eq, %85, %218 : vector<8x128xi32>
    %220 = arith.select %219, %196, %202 : vector<8x128xi1>, vector<8x128xf32>
    %221 = arith.select %219, %214, %203 : vector<8x128xi1>, vector<8x128xf32>
    %222 = arith.select %219, %199, %204 : vector<8x128xi1>, vector<8x128xf32>
    %223 = arith.select %219, %217, %205 : vector<8x128xi1>, vector<8x128xf32>
    %c2_i32_117 = arith.constant 2 : i32
    %224 = vector.broadcast %c2_i32_117 : i32 to vector<8x128xi32>
    %225 = arith.cmpi eq, %175, %224 : vector<8x128xi32>
    %226 = arith.select %225, %196, %208 : vector<8x128xi1>, vector<8x128xf32>
    %227 = arith.select %225, %214, %209 : vector<8x128xi1>, vector<8x128xf32>
    %228 = arith.select %225, %199, %210 : vector<8x128xi1>, vector<8x128xf32>
    %229 = arith.select %225, %217, %211 : vector<8x128xi1>, vector<8x128xf32>
    %230 = arith.index_cast %c0_i32 : i32 to index
    %c0_118 = arith.constant 0 : index
    %c4 = arith.constant 4 : index
    %c0_119 = arith.constant 0 : index
    %c0_120 = arith.constant 0 : index
    %231 = vector.load %arg4[%230, %c0_118, %c4, %c0_119, %c0_120] : memref<1x2x16x8x128xf32, #tpu.memory_space<vmem>>, vector<1x1x1x8x128xf32>
    %232 = vector.shape_cast %231 : vector<1x1x1x8x128xf32> to vector<8x128xf32>
    %233 = arith.index_cast %c0_i32 : i32 to index
    %c1_121 = arith.constant 1 : index
    %c4_122 = arith.constant 4 : index
    %c0_123 = arith.constant 0 : index
    %c0_124 = arith.constant 0 : index
    %234 = vector.load %arg4[%233, %c1_121, %c4_122, %c0_123, %c0_124] : memref<1x2x16x8x128xf32, #tpu.memory_space<vmem>>, vector<1x1x1x8x128xf32>
    %235 = vector.shape_cast %234 : vector<1x1x1x8x128xf32> to vector<8x128xf32>
    %c3_i32 = arith.constant 3 : i32
    %236 = vector.broadcast %c3_i32 : i32 to vector<8x128xi32>
    %237 = arith.cmpi eq, %85, %236 : vector<8x128xi32>
    %238 = arith.select %237, %214, %220 : vector<8x128xi1>, vector<8x128xf32>
    %239 = arith.select %237, %232, %221 : vector<8x128xi1>, vector<8x128xf32>
    %240 = arith.select %237, %217, %222 : vector<8x128xi1>, vector<8x128xf32>
    %241 = arith.select %237, %235, %223 : vector<8x128xi1>, vector<8x128xf32>
    %c3_i32_125 = arith.constant 3 : i32
    %242 = vector.broadcast %c3_i32_125 : i32 to vector<8x128xi32>
    %243 = arith.cmpi eq, %175, %242 : vector<8x128xi32>
    %244 = arith.select %243, %214, %226 : vector<8x128xi1>, vector<8x128xf32>
    %245 = arith.select %243, %232, %227 : vector<8x128xi1>, vector<8x128xf32>
    %246 = arith.select %243, %217, %228 : vector<8x128xi1>, vector<8x128xf32>
    %247 = arith.select %243, %235, %229 : vector<8x128xi1>, vector<8x128xf32>
    %248 = arith.index_cast %c0_i32 : i32 to index
    %c0_126 = arith.constant 0 : index
    %c5 = arith.constant 5 : index
    %c0_127 = arith.constant 0 : index
    %c0_128 = arith.constant 0 : index
    %249 = vector.load %arg4[%248, %c0_126, %c5, %c0_127, %c0_128] : memref<1x2x16x8x128xf32, #tpu.memory_space<vmem>>, vector<1x1x1x8x128xf32>
    %250 = vector.shape_cast %249 : vector<1x1x1x8x128xf32> to vector<8x128xf32>
    %251 = arith.index_cast %c0_i32 : i32 to index
    %c1_129 = arith.constant 1 : index
    %c5_130 = arith.constant 5 : index
    %c0_131 = arith.constant 0 : index
    %c0_132 = arith.constant 0 : index
    %252 = vector.load %arg4[%251, %c1_129, %c5_130, %c0_131, %c0_132] : memref<1x2x16x8x128xf32, #tpu.memory_space<vmem>>, vector<1x1x1x8x128xf32>
    %253 = vector.shape_cast %252 : vector<1x1x1x8x128xf32> to vector<8x128xf32>
    %c4_i32 = arith.constant 4 : i32
    %254 = vector.broadcast %c4_i32 : i32 to vector<8x128xi32>
    %255 = arith.cmpi eq, %85, %254 : vector<8x128xi32>
    %256 = arith.select %255, %232, %238 : vector<8x128xi1>, vector<8x128xf32>
    %257 = arith.select %255, %250, %239 : vector<8x128xi1>, vector<8x128xf32>
    %258 = arith.select %255, %235, %240 : vector<8x128xi1>, vector<8x128xf32>
    %259 = arith.select %255, %253, %241 : vector<8x128xi1>, vector<8x128xf32>
    %c4_i32_133 = arith.constant 4 : i32
    %260 = vector.broadcast %c4_i32_133 : i32 to vector<8x128xi32>
    %261 = arith.cmpi eq, %175, %260 : vector<8x128xi32>
    %262 = arith.select %261, %232, %244 : vector<8x128xi1>, vector<8x128xf32>
    %263 = arith.select %261, %250, %245 : vector<8x128xi1>, vector<8x128xf32>
    %264 = arith.select %261, %235, %246 : vector<8x128xi1>, vector<8x128xf32>
    %265 = arith.select %261, %253, %247 : vector<8x128xi1>, vector<8x128xf32>
    %266 = arith.index_cast %c0_i32 : i32 to index
    %c0_134 = arith.constant 0 : index
    %c6 = arith.constant 6 : index
    %c0_135 = arith.constant 0 : index
    %c0_136 = arith.constant 0 : index
    %267 = vector.load %arg4[%266, %c0_134, %c6, %c0_135, %c0_136] : memref<1x2x16x8x128xf32, #tpu.memory_space<vmem>>, vector<1x1x1x8x128xf32>
    %268 = vector.shape_cast %267 : vector<1x1x1x8x128xf32> to vector<8x128xf32>
    %269 = arith.index_cast %c0_i32 : i32 to index
    %c1_137 = arith.constant 1 : index
    %c6_138 = arith.constant 6 : index
    %c0_139 = arith.constant 0 : index
    %c0_140 = arith.constant 0 : index
    %270 = vector.load %arg4[%269, %c1_137, %c6_138, %c0_139, %c0_140] : memref<1x2x16x8x128xf32, #tpu.memory_space<vmem>>, vector<1x1x1x8x128xf32>
    %271 = vector.shape_cast %270 : vector<1x1x1x8x128xf32> to vector<8x128xf32>
    %c5_i32 = arith.constant 5 : i32
    %272 = vector.broadcast %c5_i32 : i32 to vector<8x128xi32>
    %273 = arith.cmpi eq, %85, %272 : vector<8x128xi32>
    %274 = arith.select %273, %250, %256 : vector<8x128xi1>, vector<8x128xf32>
    %275 = arith.select %273, %268, %257 : vector<8x128xi1>, vector<8x128xf32>
    %276 = arith.select %273, %253, %258 : vector<8x128xi1>, vector<8x128xf32>
    %277 = arith.select %273, %271, %259 : vector<8x128xi1>, vector<8x128xf32>
    %c5_i32_141 = arith.constant 5 : i32
    %278 = vector.broadcast %c5_i32_141 : i32 to vector<8x128xi32>
    %279 = arith.cmpi eq, %175, %278 : vector<8x128xi32>
    %280 = arith.select %279, %250, %262 : vector<8x128xi1>, vector<8x128xf32>
    %281 = arith.select %279, %268, %263 : vector<8x128xi1>, vector<8x128xf32>
    %282 = arith.select %279, %253, %264 : vector<8x128xi1>, vector<8x128xf32>
    %283 = arith.select %279, %271, %265 : vector<8x128xi1>, vector<8x128xf32>
    %284 = arith.index_cast %c0_i32 : i32 to index
    %c0_142 = arith.constant 0 : index
    %c7 = arith.constant 7 : index
    %c0_143 = arith.constant 0 : index
    %c0_144 = arith.constant 0 : index
    %285 = vector.load %arg4[%284, %c0_142, %c7, %c0_143, %c0_144] : memref<1x2x16x8x128xf32, #tpu.memory_space<vmem>>, vector<1x1x1x8x128xf32>
    %286 = vector.shape_cast %285 : vector<1x1x1x8x128xf32> to vector<8x128xf32>
    %287 = arith.index_cast %c0_i32 : i32 to index
    %c1_145 = arith.constant 1 : index
    %c7_146 = arith.constant 7 : index
    %c0_147 = arith.constant 0 : index
    %c0_148 = arith.constant 0 : index
    %288 = vector.load %arg4[%287, %c1_145, %c7_146, %c0_147, %c0_148] : memref<1x2x16x8x128xf32, #tpu.memory_space<vmem>>, vector<1x1x1x8x128xf32>
    %289 = vector.shape_cast %288 : vector<1x1x1x8x128xf32> to vector<8x128xf32>
    %c6_i32 = arith.constant 6 : i32
    %290 = vector.broadcast %c6_i32 : i32 to vector<8x128xi32>
    %291 = arith.cmpi eq, %85, %290 : vector<8x128xi32>
    %292 = arith.select %291, %268, %274 : vector<8x128xi1>, vector<8x128xf32>
    %293 = arith.select %291, %286, %275 : vector<8x128xi1>, vector<8x128xf32>
    %294 = arith.select %291, %271, %276 : vector<8x128xi1>, vector<8x128xf32>
    %295 = arith.select %291, %289, %277 : vector<8x128xi1>, vector<8x128xf32>
    %c6_i32_149 = arith.constant 6 : i32
    %296 = vector.broadcast %c6_i32_149 : i32 to vector<8x128xi32>
    %297 = arith.cmpi eq, %175, %296 : vector<8x128xi32>
    %298 = arith.select %297, %268, %280 : vector<8x128xi1>, vector<8x128xf32>
    %299 = arith.select %297, %286, %281 : vector<8x128xi1>, vector<8x128xf32>
    %300 = arith.select %297, %271, %282 : vector<8x128xi1>, vector<8x128xf32>
    %301 = arith.select %297, %289, %283 : vector<8x128xi1>, vector<8x128xf32>
    %302 = arith.index_cast %c0_i32 : i32 to index
    %c0_150 = arith.constant 0 : index
    %c8 = arith.constant 8 : index
    %c0_151 = arith.constant 0 : index
    %c0_152 = arith.constant 0 : index
    %303 = vector.load %arg4[%302, %c0_150, %c8, %c0_151, %c0_152] : memref<1x2x16x8x128xf32, #tpu.memory_space<vmem>>, vector<1x1x1x8x128xf32>
    %304 = vector.shape_cast %303 : vector<1x1x1x8x128xf32> to vector<8x128xf32>
    %305 = arith.index_cast %c0_i32 : i32 to index
    %c1_153 = arith.constant 1 : index
    %c8_154 = arith.constant 8 : index
    %c0_155 = arith.constant 0 : index
    %c0_156 = arith.constant 0 : index
    %306 = vector.load %arg4[%305, %c1_153, %c8_154, %c0_155, %c0_156] : memref<1x2x16x8x128xf32, #tpu.memory_space<vmem>>, vector<1x1x1x8x128xf32>
    %307 = vector.shape_cast %306 : vector<1x1x1x8x128xf32> to vector<8x128xf32>
    %c7_i32 = arith.constant 7 : i32
    %308 = vector.broadcast %c7_i32 : i32 to vector<8x128xi32>
    %309 = arith.cmpi eq, %85, %308 : vector<8x128xi32>
    %310 = arith.select %309, %286, %292 : vector<8x128xi1>, vector<8x128xf32>
    %311 = arith.select %309, %304, %293 : vector<8x128xi1>, vector<8x128xf32>
    %312 = arith.select %309, %289, %294 : vector<8x128xi1>, vector<8x128xf32>
    %313 = arith.select %309, %307, %295 : vector<8x128xi1>, vector<8x128xf32>
    %c7_i32_157 = arith.constant 7 : i32
    %314 = vector.broadcast %c7_i32_157 : i32 to vector<8x128xi32>
    %315 = arith.cmpi eq, %175, %314 : vector<8x128xi32>
    %316 = arith.select %315, %286, %298 : vector<8x128xi1>, vector<8x128xf32>
    %317 = arith.select %315, %304, %299 : vector<8x128xi1>, vector<8x128xf32>
    %318 = arith.select %315, %289, %300 : vector<8x128xi1>, vector<8x128xf32>
    %319 = arith.select %315, %307, %301 : vector<8x128xi1>, vector<8x128xf32>
    %320 = arith.index_cast %c0_i32 : i32 to index
    %c0_158 = arith.constant 0 : index
    %c9 = arith.constant 9 : index
    %c0_159 = arith.constant 0 : index
    %c0_160 = arith.constant 0 : index
    %321 = vector.load %arg4[%320, %c0_158, %c9, %c0_159, %c0_160] : memref<1x2x16x8x128xf32, #tpu.memory_space<vmem>>, vector<1x1x1x8x128xf32>
    %322 = vector.shape_cast %321 : vector<1x1x1x8x128xf32> to vector<8x128xf32>
    %323 = arith.index_cast %c0_i32 : i32 to index
    %c1_161 = arith.constant 1 : index
    %c9_162 = arith.constant 9 : index
    %c0_163 = arith.constant 0 : index
    %c0_164 = arith.constant 0 : index
    %324 = vector.load %arg4[%323, %c1_161, %c9_162, %c0_163, %c0_164] : memref<1x2x16x8x128xf32, #tpu.memory_space<vmem>>, vector<1x1x1x8x128xf32>
    %325 = vector.shape_cast %324 : vector<1x1x1x8x128xf32> to vector<8x128xf32>
    %c8_i32 = arith.constant 8 : i32
    %326 = vector.broadcast %c8_i32 : i32 to vector<8x128xi32>
    %327 = arith.cmpi eq, %85, %326 : vector<8x128xi32>
    %328 = arith.select %327, %304, %310 : vector<8x128xi1>, vector<8x128xf32>
    %329 = arith.select %327, %322, %311 : vector<8x128xi1>, vector<8x128xf32>
    %330 = arith.select %327, %307, %312 : vector<8x128xi1>, vector<8x128xf32>
    %331 = arith.select %327, %325, %313 : vector<8x128xi1>, vector<8x128xf32>
    %c8_i32_165 = arith.constant 8 : i32
    %332 = vector.broadcast %c8_i32_165 : i32 to vector<8x128xi32>
    %333 = arith.cmpi eq, %175, %332 : vector<8x128xi32>
    %334 = arith.select %333, %304, %316 : vector<8x128xi1>, vector<8x128xf32>
    %335 = arith.select %333, %322, %317 : vector<8x128xi1>, vector<8x128xf32>
    %336 = arith.select %333, %307, %318 : vector<8x128xi1>, vector<8x128xf32>
    %337 = arith.select %333, %325, %319 : vector<8x128xi1>, vector<8x128xf32>
    %338 = arith.index_cast %c0_i32 : i32 to index
    %c0_166 = arith.constant 0 : index
    %c10 = arith.constant 10 : index
    %c0_167 = arith.constant 0 : index
    %c0_168 = arith.constant 0 : index
    %339 = vector.load %arg4[%338, %c0_166, %c10, %c0_167, %c0_168] : memref<1x2x16x8x128xf32, #tpu.memory_space<vmem>>, vector<1x1x1x8x128xf32>
    %340 = vector.shape_cast %339 : vector<1x1x1x8x128xf32> to vector<8x128xf32>
    %341 = arith.index_cast %c0_i32 : i32 to index
    %c1_169 = arith.constant 1 : index
    %c10_170 = arith.constant 10 : index
    %c0_171 = arith.constant 0 : index
    %c0_172 = arith.constant 0 : index
    %342 = vector.load %arg4[%341, %c1_169, %c10_170, %c0_171, %c0_172] : memref<1x2x16x8x128xf32, #tpu.memory_space<vmem>>, vector<1x1x1x8x128xf32>
    %343 = vector.shape_cast %342 : vector<1x1x1x8x128xf32> to vector<8x128xf32>
    %c9_i32 = arith.constant 9 : i32
    %344 = vector.broadcast %c9_i32 : i32 to vector<8x128xi32>
    %345 = arith.cmpi eq, %85, %344 : vector<8x128xi32>
    %346 = arith.select %345, %322, %328 : vector<8x128xi1>, vector<8x128xf32>
    %347 = arith.select %345, %340, %329 : vector<8x128xi1>, vector<8x128xf32>
    %348 = arith.select %345, %325, %330 : vector<8x128xi1>, vector<8x128xf32>
    %349 = arith.select %345, %343, %331 : vector<8x128xi1>, vector<8x128xf32>
    %c9_i32_173 = arith.constant 9 : i32
    %350 = vector.broadcast %c9_i32_173 : i32 to vector<8x128xi32>
    %351 = arith.cmpi eq, %175, %350 : vector<8x128xi32>
    %352 = arith.select %351, %322, %334 : vector<8x128xi1>, vector<8x128xf32>
    %353 = arith.select %351, %340, %335 : vector<8x128xi1>, vector<8x128xf32>
    %354 = arith.select %351, %325, %336 : vector<8x128xi1>, vector<8x128xf32>
    %355 = arith.select %351, %343, %337 : vector<8x128xi1>, vector<8x128xf32>
    %356 = arith.index_cast %c0_i32 : i32 to index
    %c0_174 = arith.constant 0 : index
    %c11 = arith.constant 11 : index
    %c0_175 = arith.constant 0 : index
    %c0_176 = arith.constant 0 : index
    %357 = vector.load %arg4[%356, %c0_174, %c11, %c0_175, %c0_176] : memref<1x2x16x8x128xf32, #tpu.memory_space<vmem>>, vector<1x1x1x8x128xf32>
    %358 = vector.shape_cast %357 : vector<1x1x1x8x128xf32> to vector<8x128xf32>
    %359 = arith.index_cast %c0_i32 : i32 to index
    %c1_177 = arith.constant 1 : index
    %c11_178 = arith.constant 11 : index
    %c0_179 = arith.constant 0 : index
    %c0_180 = arith.constant 0 : index
    %360 = vector.load %arg4[%359, %c1_177, %c11_178, %c0_179, %c0_180] : memref<1x2x16x8x128xf32, #tpu.memory_space<vmem>>, vector<1x1x1x8x128xf32>
    %361 = vector.shape_cast %360 : vector<1x1x1x8x128xf32> to vector<8x128xf32>
    %c10_i32 = arith.constant 10 : i32
    %362 = vector.broadcast %c10_i32 : i32 to vector<8x128xi32>
    %363 = arith.cmpi eq, %85, %362 : vector<8x128xi32>
    %364 = arith.select %363, %340, %346 : vector<8x128xi1>, vector<8x128xf32>
    %365 = arith.select %363, %358, %347 : vector<8x128xi1>, vector<8x128xf32>
    %366 = arith.select %363, %343, %348 : vector<8x128xi1>, vector<8x128xf32>
    %367 = arith.select %363, %361, %349 : vector<8x128xi1>, vector<8x128xf32>
    %c10_i32_181 = arith.constant 10 : i32
    %368 = vector.broadcast %c10_i32_181 : i32 to vector<8x128xi32>
    %369 = arith.cmpi eq, %175, %368 : vector<8x128xi32>
    %370 = arith.select %369, %340, %352 : vector<8x128xi1>, vector<8x128xf32>
    %371 = arith.select %369, %358, %353 : vector<8x128xi1>, vector<8x128xf32>
    %372 = arith.select %369, %343, %354 : vector<8x128xi1>, vector<8x128xf32>
    %373 = arith.select %369, %361, %355 : vector<8x128xi1>, vector<8x128xf32>
    %374 = arith.index_cast %c0_i32 : i32 to index
    %c0_182 = arith.constant 0 : index
    %c12 = arith.constant 12 : index
    %c0_183 = arith.constant 0 : index
    %c0_184 = arith.constant 0 : index
    %375 = vector.load %arg4[%374, %c0_182, %c12, %c0_183, %c0_184] : memref<1x2x16x8x128xf32, #tpu.memory_space<vmem>>, vector<1x1x1x8x128xf32>
    %376 = vector.shape_cast %375 : vector<1x1x1x8x128xf32> to vector<8x128xf32>
    %377 = arith.index_cast %c0_i32 : i32 to index
    %c1_185 = arith.constant 1 : index
    %c12_186 = arith.constant 12 : index
    %c0_187 = arith.constant 0 : index
    %c0_188 = arith.constant 0 : index
    %378 = vector.load %arg4[%377, %c1_185, %c12_186, %c0_187, %c0_188] : memref<1x2x16x8x128xf32, #tpu.memory_space<vmem>>, vector<1x1x1x8x128xf32>
    %379 = vector.shape_cast %378 : vector<1x1x1x8x128xf32> to vector<8x128xf32>
    %c11_i32 = arith.constant 11 : i32
    %380 = vector.broadcast %c11_i32 : i32 to vector<8x128xi32>
    %381 = arith.cmpi eq, %85, %380 : vector<8x128xi32>
    %382 = arith.select %381, %358, %364 : vector<8x128xi1>, vector<8x128xf32>
    %383 = arith.select %381, %376, %365 : vector<8x128xi1>, vector<8x128xf32>
    %384 = arith.select %381, %361, %366 : vector<8x128xi1>, vector<8x128xf32>
    %385 = arith.select %381, %379, %367 : vector<8x128xi1>, vector<8x128xf32>
    %c11_i32_189 = arith.constant 11 : i32
    %386 = vector.broadcast %c11_i32_189 : i32 to vector<8x128xi32>
    %387 = arith.cmpi eq, %175, %386 : vector<8x128xi32>
    %388 = arith.select %387, %358, %370 : vector<8x128xi1>, vector<8x128xf32>
    %389 = arith.select %387, %376, %371 : vector<8x128xi1>, vector<8x128xf32>
    %390 = arith.select %387, %361, %372 : vector<8x128xi1>, vector<8x128xf32>
    %391 = arith.select %387, %379, %373 : vector<8x128xi1>, vector<8x128xf32>
    %392 = arith.index_cast %c0_i32 : i32 to index
    %c0_190 = arith.constant 0 : index
    %c13 = arith.constant 13 : index
    %c0_191 = arith.constant 0 : index
    %c0_192 = arith.constant 0 : index
    %393 = vector.load %arg4[%392, %c0_190, %c13, %c0_191, %c0_192] : memref<1x2x16x8x128xf32, #tpu.memory_space<vmem>>, vector<1x1x1x8x128xf32>
    %394 = vector.shape_cast %393 : vector<1x1x1x8x128xf32> to vector<8x128xf32>
    %395 = arith.index_cast %c0_i32 : i32 to index
    %c1_193 = arith.constant 1 : index
    %c13_194 = arith.constant 13 : index
    %c0_195 = arith.constant 0 : index
    %c0_196 = arith.constant 0 : index
    %396 = vector.load %arg4[%395, %c1_193, %c13_194, %c0_195, %c0_196] : memref<1x2x16x8x128xf32, #tpu.memory_space<vmem>>, vector<1x1x1x8x128xf32>
    %397 = vector.shape_cast %396 : vector<1x1x1x8x128xf32> to vector<8x128xf32>
    %c12_i32 = arith.constant 12 : i32
    %398 = vector.broadcast %c12_i32 : i32 to vector<8x128xi32>
    %399 = arith.cmpi eq, %85, %398 : vector<8x128xi32>
    %400 = arith.select %399, %376, %382 : vector<8x128xi1>, vector<8x128xf32>
    %401 = arith.select %399, %394, %383 : vector<8x128xi1>, vector<8x128xf32>
    %402 = arith.select %399, %379, %384 : vector<8x128xi1>, vector<8x128xf32>
    %403 = arith.select %399, %397, %385 : vector<8x128xi1>, vector<8x128xf32>
    %c12_i32_197 = arith.constant 12 : i32
    %404 = vector.broadcast %c12_i32_197 : i32 to vector<8x128xi32>
    %405 = arith.cmpi eq, %175, %404 : vector<8x128xi32>
    %406 = arith.select %405, %376, %388 : vector<8x128xi1>, vector<8x128xf32>
    %407 = arith.select %405, %394, %389 : vector<8x128xi1>, vector<8x128xf32>
    %408 = arith.select %405, %379, %390 : vector<8x128xi1>, vector<8x128xf32>
    %409 = arith.select %405, %397, %391 : vector<8x128xi1>, vector<8x128xf32>
    %410 = arith.index_cast %c0_i32 : i32 to index
    %c0_198 = arith.constant 0 : index
    %c14 = arith.constant 14 : index
    %c0_199 = arith.constant 0 : index
    %c0_200 = arith.constant 0 : index
    %411 = vector.load %arg4[%410, %c0_198, %c14, %c0_199, %c0_200] : memref<1x2x16x8x128xf32, #tpu.memory_space<vmem>>, vector<1x1x1x8x128xf32>
    %412 = vector.shape_cast %411 : vector<1x1x1x8x128xf32> to vector<8x128xf32>
    %413 = arith.index_cast %c0_i32 : i32 to index
    %c1_201 = arith.constant 1 : index
    %c14_202 = arith.constant 14 : index
    %c0_203 = arith.constant 0 : index
    %c0_204 = arith.constant 0 : index
    %414 = vector.load %arg4[%413, %c1_201, %c14_202, %c0_203, %c0_204] : memref<1x2x16x8x128xf32, #tpu.memory_space<vmem>>, vector<1x1x1x8x128xf32>
    %415 = vector.shape_cast %414 : vector<1x1x1x8x128xf32> to vector<8x128xf32>
    %c13_i32 = arith.constant 13 : i32
    %416 = vector.broadcast %c13_i32 : i32 to vector<8x128xi32>
    %417 = arith.cmpi eq, %85, %416 : vector<8x128xi32>
    %418 = arith.select %417, %394, %400 : vector<8x128xi1>, vector<8x128xf32>
    %419 = arith.select %417, %412, %401 : vector<8x128xi1>, vector<8x128xf32>
    %420 = arith.select %417, %397, %402 : vector<8x128xi1>, vector<8x128xf32>
    %421 = arith.select %417, %415, %403 : vector<8x128xi1>, vector<8x128xf32>
    %c13_i32_205 = arith.constant 13 : i32
    %422 = vector.broadcast %c13_i32_205 : i32 to vector<8x128xi32>
    %423 = arith.cmpi eq, %175, %422 : vector<8x128xi32>
    %424 = arith.select %423, %394, %406 : vector<8x128xi1>, vector<8x128xf32>
    %425 = arith.select %423, %412, %407 : vector<8x128xi1>, vector<8x128xf32>
    %426 = arith.select %423, %397, %408 : vector<8x128xi1>, vector<8x128xf32>
    %427 = arith.select %423, %415, %409 : vector<8x128xi1>, vector<8x128xf32>
    %428 = arith.index_cast %c0_i32 : i32 to index
    %c0_206 = arith.constant 0 : index
    %c15 = arith.constant 15 : index
    %c0_207 = arith.constant 0 : index
    %c0_208 = arith.constant 0 : index
    %429 = vector.load %arg4[%428, %c0_206, %c15, %c0_207, %c0_208] : memref<1x2x16x8x128xf32, #tpu.memory_space<vmem>>, vector<1x1x1x8x128xf32>
    %430 = vector.shape_cast %429 : vector<1x1x1x8x128xf32> to vector<8x128xf32>
    %431 = arith.index_cast %c0_i32 : i32 to index
    %c1_209 = arith.constant 1 : index
    %c15_210 = arith.constant 15 : index
    %c0_211 = arith.constant 0 : index
    %c0_212 = arith.constant 0 : index
    %432 = vector.load %arg4[%431, %c1_209, %c15_210, %c0_211, %c0_212] : memref<1x2x16x8x128xf32, #tpu.memory_space<vmem>>, vector<1x1x1x8x128xf32>
    %433 = vector.shape_cast %432 : vector<1x1x1x8x128xf32> to vector<8x128xf32>
    %c14_i32_213 = arith.constant 14 : i32
    %434 = vector.broadcast %c14_i32_213 : i32 to vector<8x128xi32>
    %435 = arith.cmpi eq, %85, %434 : vector<8x128xi32>
    %436 = arith.select %435, %412, %418 : vector<8x128xi1>, vector<8x128xf32>
    %437 = arith.select %435, %430, %419 : vector<8x128xi1>, vector<8x128xf32>
    %438 = arith.select %435, %415, %420 : vector<8x128xi1>, vector<8x128xf32>
    %439 = arith.select %435, %433, %421 : vector<8x128xi1>, vector<8x128xf32>
    %c14_i32_214 = arith.constant 14 : i32
    %440 = vector.broadcast %c14_i32_214 : i32 to vector<8x128xi32>
    %441 = arith.cmpi eq, %175, %440 : vector<8x128xi32>
    %442 = arith.select %441, %412, %424 : vector<8x128xi1>, vector<8x128xf32>
    %443 = arith.select %441, %430, %425 : vector<8x128xi1>, vector<8x128xf32>
    %444 = arith.select %441, %415, %426 : vector<8x128xi1>, vector<8x128xf32>
    %445 = arith.select %441, %433, %427 : vector<8x128xi1>, vector<8x128xf32>
    %cst_215 = arith.constant 5.000000e-01 : f32
    %446 = vector.broadcast %cst_215 : f32 to vector<8x128xf32>
    %447 = arith.mulf %446, %438 : vector<8x128xf32>
    %448 = arith.subf %439, %438 : vector<8x128xf32>
    %cst_216 = arith.constant 0.636619746 : f32
    %449 = vector.broadcast %cst_216 : f32 to vector<8x128xf32>
    %450 = arith.mulf %449, %448 : vector<8x128xf32>
    %451 = arith.subf %437, %436 : vector<8x128xf32>
    %cst_217 = arith.constant 3.8197186 : f32
    %452 = vector.broadcast %cst_217 : f32 to vector<8x128xf32>
    %453 = arith.mulf %452, %451 : vector<8x128xf32>
    %cst_218 = arith.constant 2.000000e+00 : f32
    %454 = vector.broadcast %cst_218 : f32 to vector<8x128xf32>
    %455 = arith.mulf %454, %438 : vector<8x128xf32>
    %456 = arith.addf %455, %439 : vector<8x128xf32>
    %cst_219 = arith.constant 0.04363323 : f32
    %457 = vector.broadcast %cst_219 : f32 to vector<8x128xf32>
    %458 = arith.mulf %457, %456 : vector<8x128xf32>
    %459 = arith.subf %453, %458 : vector<8x128xf32>
    %460 = arith.mulf %91, %450 : vector<8x128xf32>
    %461 = arith.addf %447, %460 : vector<8x128xf32>
    %462 = arith.mulf %91, %461 : vector<8x128xf32>
    %463 = arith.addf %459, %462 : vector<8x128xf32>
    %464 = arith.mulf %91, %463 : vector<8x128xf32>
    %465 = arith.addf %436, %464 : vector<8x128xf32>
    %466 = arith.addf %0, %465 : vector<8x128xf32>
    %cst_220 = arith.constant 5.000000e-01 : f32
    %467 = vector.broadcast %cst_220 : f32 to vector<8x128xf32>
    %468 = arith.mulf %467, %444 : vector<8x128xf32>
    %469 = arith.subf %445, %444 : vector<8x128xf32>
    %cst_221 = arith.constant 0.636619746 : f32
    %470 = vector.broadcast %cst_221 : f32 to vector<8x128xf32>
    %471 = arith.mulf %470, %469 : vector<8x128xf32>
    %472 = arith.subf %443, %442 : vector<8x128xf32>
    %cst_222 = arith.constant 3.8197186 : f32
    %473 = vector.broadcast %cst_222 : f32 to vector<8x128xf32>
    %474 = arith.mulf %473, %472 : vector<8x128xf32>
    %cst_223 = arith.constant 2.000000e+00 : f32
    %475 = vector.broadcast %cst_223 : f32 to vector<8x128xf32>
    %476 = arith.mulf %475, %444 : vector<8x128xf32>
    %477 = arith.addf %476, %445 : vector<8x128xf32>
    %cst_224 = arith.constant 0.04363323 : f32
    %478 = vector.broadcast %cst_224 : f32 to vector<8x128xf32>
    %479 = arith.mulf %478, %477 : vector<8x128xf32>
    %480 = arith.subf %474, %479 : vector<8x128xf32>
    %481 = arith.mulf %181, %471 : vector<8x128xf32>
    %482 = arith.addf %468, %481 : vector<8x128xf32>
    %483 = arith.mulf %181, %482 : vector<8x128xf32>
    %484 = arith.addf %480, %483 : vector<8x128xf32>
    %485 = arith.mulf %181, %484 : vector<8x128xf32>
    %486 = arith.addf %442, %485 : vector<8x128xf32>
    %487 = arith.addf %1, %486 : vector<8x128xf32>
    %c1_i32_225 = arith.constant 1 : i32
    %c0_226 = arith.constant 0 : index
    %c0_227 = arith.constant 0 : index
    %c0_228 = arith.constant 0 : index
    %c0_229 = arith.constant 0 : index
    %488 = vector.load %arg5[%c0_226, %c0_227, %c0_228, %c0_229] : memref<1x2x8x128xf32, #tpu.memory_space<vmem>>, vector<1x1x8x128xf32>
    %489 = vector.shape_cast %488 : vector<1x1x8x128xf32> to vector<8x128xf32>
    %490 = vector.shape_cast %466 : vector<8x128xf32> to vector<1x1x8x128xf32>
    tpu.vector_store %arg5[%c0_226, %c0_227, %c0_228, %c0_229], %490 {strides = array<i32>} : memref<1x2x8x128xf32, #tpu.memory_space<vmem>>, vector<1x1x8x128xf32>,
    %c0_230 = arith.constant 0 : index
    %c1_231 = arith.constant 1 : index
    %c0_232 = arith.constant 0 : index
    %c0_233 = arith.constant 0 : index
    %491 = vector.load %arg5[%c0_230, %c1_231, %c0_232, %c0_233] : memref<1x2x8x128xf32, #tpu.memory_space<vmem>>, vector<1x1x8x128xf32>
    %492 = vector.shape_cast %491 : vector<1x1x8x128xf32> to vector<8x128xf32>
    %493 = vector.shape_cast %487 : vector<8x128xf32> to vector<1x1x8x128xf32>
    tpu.vector_store %arg5[%c0_230, %c1_231, %c0_232, %c0_233], %493 {strides = array<i32>} : memref<1x2x8x128xf32, #tpu.memory_space<vmem>>, vector<1x1x8x128xf32>,
    return
  }
  func.func @transform_0(%arg0: i32, %arg1: i32) -> (i32, i32, i32, i32, i32) {
    %c0_i32 = arith.constant 0 : i32
    %c0_i32_0 = arith.constant 0 : i32
    %c0_i32_1 = arith.constant 0 : i32
    %c0_i32_2 = arith.constant 0 : i32
    return %arg1, %c0_i32, %arg0, %c0_i32_0, %c0_i32_1 : i32, i32, i32, i32, i32
  }
  func.func @transform_1(%arg0: i32, %arg1: i32) -> (i32, i32, i32, i32, i32) {
    %c0_i32 = arith.constant 0 : i32
    %c0_i32_0 = arith.constant 0 : i32
    %c0_i32_1 = arith.constant 0 : i32
    %c0_i32_2 = arith.constant 0 : i32
    return %arg1, %c0_i32, %arg0, %c0_i32_0, %c0_i32_1 : i32, i32, i32, i32, i32
  }
  func.func @transform_2(%arg0: i32, %arg1: i32) -> (i32, i32, i32, i32, i32) {
    %c0_i32 = arith.constant 0 : i32
    %c0_i32_0 = arith.constant 0 : i32
    %c0_i32_1 = arith.constant 0 : i32
    %c0_i32_2 = arith.constant 0 : i32
    %c0_i32_3 = arith.constant 0 : i32
    return %arg0, %c0_i32, %c0_i32_0, %c0_i32_1, %c0_i32_2 : i32, i32, i32, i32, i32
  }
  func.func @transform_3(%arg0: i32, %arg1: i32) -> (i32, i32, i32, i32) {
    %c0_i32 = arith.constant 0 : i32
    %c0_i32_0 = arith.constant 0 : i32
    %c0_i32_1 = arith.constant 0 : i32
    return %arg0, %arg1, %c0_i32, %c0_i32_0 : i32, i32, i32, i32
  }
}

</mosaic_0001>

<bundles_post_ra>
// kernel: fwd.1
= control target key start
LH: loop header
LB: loop body
LE: loop exit
PB: predicated region body
PF: predicated region fallthrough
CT: control target
= control target key end

     0   :  { %s694_s0 = inlined_call_operand.vmem [shape: f32[2,3,1,8,128], index: 0, kind: input, shape index: {}]   ;;  %s695_s1 = inlined_call_operand.vmem [shape: f32[2,3,1,8,128], index: 1, kind: input, shape index: {}]   ;;  %s696_s2 = inlined_call_operand.vmem [shape: f32[1,2,16,8,128], index: 2, kind: input, shape index: {}]   ;;  %s697_s3 = inlined_call_operand.vmem [shape: f32[1,2,8,128], index: 3, kind: output, shape index: {}]  }
   0x1   :  { %v14_v0 = vld [vmem:[%s694_s0] sm:$0xff]  ;;  %v398_v1 = vld [vmem:[%s694_s0 + $0x8] sm:$0xff]  ;;  %v399_v2 = vld [vmem:[%s694_s0 + $0x10] sm:$0xff] }
   0x2   :  { %v19_v3 = vld [vmem:[%s695_s1] sm:$0xff]  ;;  %v400_v4 = vld [vmem:[%s695_s1 + $0x8] sm:$0xff]  ;;  %v401_v5 = vld [vmem:[%s695_s1 + $0x10] sm:$0xff]  ;;  %v29_v6 = vmul.f32 %v14_v0, %v14_v0  ;;  %v30_v7 = vmul.f32 %v398_v1, %v398_v1  ;;  %v32_v8 = vmul.f32 %v399_v2, %v399_v2 }
   0x3   :  { %v34_v9 = vmul.f32 %v19_v3, %v19_v3  ;;  %v404_v10 = vld [vmem:[%s694_s0 + $0x18] sm:$0xff]  ;;  %v405_v11 = vld [vmem:[%s694_s0 + $0x20] sm:$0xff]  ;;  %v406_v12 = vld [vmem:[%s694_s0 + $0x28] sm:$0xff]  ;;  %v35_v14 = vmul.f32 %v400_v4, %v400_v4  ;;  %v37_v15 = vmul.f32 %v401_v5, %v401_v5  ;;  %v24_v34 = vmul.f32 %v19_v3, %v14_v0 }
   0x4   :  { %v31_v13 = vadd.f32 %v30_v7, %v29_v6  ;;  %v407_v16 = vld [vmem:[%s695_s1 + $0x18] sm:$0xff]  ;;  %v408_v17 = vld [vmem:[%s695_s1 + $0x20] sm:$0xff]  ;;  %v101_v18 = vmul.f32 %v404_v10, %v404_v10  ;;  %v409_v19 = vld [vmem:[%s695_s1 + $0x28] sm:$0xff]  ;;  %v102_v22 = vmul.f32 %v405_v11, %v405_v11  ;;  %v104_v23 = vmul.f32 %v406_v12, %v406_v12 }
   0x5   :  { %v36_v21 = vadd.f32 %v35_v14, %v34_v9  ;;  %v106_v24 = vmul.f32 %v407_v16, %v407_v16  ;;  %v107_v25 = vmul.f32 %v408_v17, %v408_v17  ;;  %v109_v28 = vmul.f32 %v409_v19, %v409_v19 }
   0x6   :  { %v33_v20 = vadd.f32 %v32_v8, %v31_v13  ;;  %v103_v27 = vadd.f32 %v102_v22, %v101_v18  ;;  %v25_v35 = vmul.f32 %v400_v4, %v398_v1  ;;  %v96_v38 = vmul.f32 %v407_v16, %v404_v10 }
   0x7   :  { %v38_v26 = vadd.f32 %v37_v15, %v36_v21  ;;  %v108_v29 = vadd.f32 %v107_v25, %v106_v24  ;;  %v97_v39 = vmul.f32 %v408_v17, %v405_v11  ;;  %v27_v41 = vmul.f32 %v401_v5, %v399_v2 }
   0x8   :  { %v105_v31 = vadd.f32 %v104_v23, %v103_v27  ;;  %v26_v40 = vadd.f32 %v25_v35, %v24_v34  ;;  %v99_v43 = vmul.f32 %v409_v19, %v406_v12 }
   0x9   :  { %v39_v30 = vmul.f32 %v38_v26, %v33_v20  ;;  %v110_v32 = vadd.f32 %v109_v28, %v108_v29  ;;  %v98_v42 = vadd.f32 %v97_v39, %v96_v38 }
   0xa   :  { %v28_v44 = vadd.f32 %v27_v41, %v26_v40 }
   0xb   :  { %v40_v33 = vadd.f32 1e-12, %v39_v30  ;;  %v111_v36 = vmul.f32 %v110_v32, %v105_v31  ;;  %v100_v46 = vadd.f32 %v99_v43, %v98_v42 }
   0xd   :  { %448 = vrsqrt.f32 %v40_v33  ;;  %v112_v37 = vadd.f32 1e-12, %v111_v36 }
   0xf   :  { %450 = vrsqrt.f32 %v112_v37 }
  0x17   :  { %v449_v45 = vpop.eup %448 }
  0x18   :  { %v42_v47 = vmul.f32 %v449_v45, %v28_v44 }
  0x19   :  { %v451_v48 = vpop.eup %450 }
  0x1a   :  { %v402_v49 = vclamps-f32 %v42_v47, 0.999999  ;;  %v114_v50 = vmul.f32 %v451_v48, %v100_v46  ;;  %v156_v47 = vld [vmem:[%s696_s2] sm:$0xff]  ;;  %v413_v48 = vld [vmem:[%s696_s2 + $0x8] sm:$0xff] }
  0x1c   :  { %v45_v51 = vand.u32 2147483647, %v402_v49  ;;  %v410_v52 = vclamps-f32 %v114_v50, 0.999999  ;;  %vm69_vm4 = vcmp.ge.f32.partialorder %v402_v49, 0.0  ;;  %v415_v49 = vld [vmem:[%s696_s2 + $0x10] sm:$0xff] }
  0x1e   :  { %v46_v53 = vmul.f32 -0.0012624911, %v45_v51  ;;  %v60_v54 = vsub.f32 1.0, %v45_v51  ;;  %v117_v55 = vand.u32 2147483647, %v410_v52  ;;  %vm141_vm5 = vcmp.ge.f32.partialorder %v410_v52, 0.0 }
  0x1f   :  { %v414_v52 = vld [vmem:[%s696_s2 + $0x88] sm:$0xff] }
  0x20   :  { %v47_v56 = vadd.f32 0.00667009, %v46_v53  ;;  %v118_v57 = vmul.f32 -0.0012624911, %v117_v55  ;;  %v132_v59 = vsub.f32 1.0, %v117_v55  ;;  %452 = vrsqrt.f32 %v60_v54  ;;  %v416_v53 = vld [vmem:[%s696_s2 + $0x90] sm:$0xff] }
  0x21   :  { %vm63_vm0 = vcmp.eq.f32.partialorder %v60_v54, inf  ;;  %v66_v15 = vand.u32 2147483648, %v60_v54  ;;  %vm65_vm1 = vcmp.eq.f32.partialorder %v60_v54, 0.0 }
  0x22   :  { %v48_v58 = vmul.f32 %v47_v56, %v45_v51  ;;  %v119_v60 = vadd.f32 0.00667009, %v118_v57  ;;  %454 = vrsqrt.f32 %v132_v59  ;;  %vm135_vm2 = vcmp.eq.f32.partialorder %v132_v59, inf }
  0x23   :  { %v138_v22 = vand.u32 2147483648, %v132_v59  ;;  %vm137_vm3 = vcmp.eq.f32.partialorder %v132_v59, 0.0 }
  0x24   :  { %v49_v61 = vadd.f32 -0.017088126, %v48_v58  ;;  %v120_v62 = vmul.f32 %v119_v60, %v117_v55  ;;  %v417_v58 = vld [vmem:[%s696_s2 + $0x18] sm:$0xff] }
  0x26   :  { %v50_v63 = vmul.f32 %v49_v61, %v45_v51  ;;  %v121_v0 = vadd.f32 -0.017088126, %v120_v62  ;;  %v418_v62 = vld [vmem:[%s696_s2 + $0x98] sm:$0xff] }
  0x28   :  { %v51_v1 = vadd.f32 0.03089188, %v50_v63  ;;  %v122_v2 = vmul.f32 %v121_v0, %v117_v55 }
  0x2a   :  { %v52_v3 = vmul.f32 %v51_v1, %v45_v51  ;;  %v123_v4 = vadd.f32 0.03089188, %v122_v2  ;;  %v453_v6 = vpop.eup %452 }
  0x2b   :  { %v62_v12 = vmul.f32 %v453_v6, %v60_v54 }
  0x2c   :  { %v53_v5 = vadd.f32 -0.050174303, %v52_v3  ;;  %v124_v7 = vmul.f32 %v123_v4, %v117_v55  ;;  %v455_v10 = vpop.eup %454 }
  0x2d   :  { %v134_v17 = vmul.f32 %v455_v10, %v132_v59  ;;  %v64_v19 = vsel %vm63_vm0, %v60_v54, %v62_v12  ;;  %v420_v10 = vld [vmem:[%s696_s2 + $0xa0] sm:$0xff] }
  0x2e   :  { %v54_v8 = vmul.f32 %v53_v5, %v45_v51  ;;  %v125_v9 = vadd.f32 -0.050174303, %v124_v7  ;;  %v67_v23 = vsel %vm65_vm1, %v66_v15, %v64_v19 }
  0x2f   :  { %v136_v25 = vsel %vm135_vm2, %v132_v59, %v134_v17 }
  0x30   :  { %v55_v11 = vadd.f32 0.08897899, %v54_v8  ;;  %v126_v13 = vmul.f32 %v125_v9, %v117_v55  ;;  %v139_v29 = vsel %vm137_vm3, %v138_v22, %v136_v25  ;;  %v419_v9 = vld [vmem:[%s696_s2 + $0x20] sm:$0xff] }
  0x32   :  { %v56_v14 = vmul.f32 %v55_v11, %v45_v51  ;;  %v127_v16 = vadd.f32 0.08897899, %v126_v13 }
  0x34   :  { %v57_v18 = vadd.f32 -0.2145988, %v56_v14  ;;  %v128_v20 = vmul.f32 %v127_v16, %v117_v55 }
  0x36   :  { %v58_v21 = vmul.f32 %v57_v18, %v45_v51  ;;  %v129_v24 = vadd.f32 -0.2145988, %v128_v20  ;;  %v412_v51 = vld [vmem:[%s696_s2 + $0x80] sm:$0xff]  ;;  %v421_v20 = vld [vmem:[%s696_s2 + $0x28] sm:$0xff] }
  0x38   :  { %v59_v26 = vadd.f32 1.5707963, %v58_v21  ;;  %v130_v27 = vmul.f32 %v129_v24, %v117_v55  ;;  %v422_v21 = vld [vmem:[%s696_s2 + $0xa8] sm:$0xff] }
  0x3a   :  { %v68_v28 = vmul.f32 %v67_v23, %v59_v26  ;;  %v131_v30 = vadd.f32 1.5707963, %v130_v27  ;;  %v423_v27 = vld [vmem:[%s696_s2 + $0x30] sm:$0xff] }
  0x3c   :  { %v70_v31 = vsub.f32 3.1415927, %v68_v28  ;;  %v140_v32 = vmul.f32 %v139_v29, %v131_v30 }
  0x3e   :  { %v512_v33 = vsel %vm69_vm4, %v68_v28, %v70_v31  ;;  %v142_v35 = vsub.f32 3.1415927, %v140_v32  ;;  %v424_v28 = vld [vmem:[%s696_s2 + $0xb0] sm:$0xff] }
  0x3f   :  { %v403_v34 = vadd.f32 0.3926991, %v512_v33 }
  0x40   :  { %v515_v37 = vsel %vm141_vm5, %v140_v32, %v142_v35 }
  0x41   :  { %v73_v36 = vmul.f32 3.8197186, %v403_v34  ;;  %v411_v38 = vadd.f32 0.3926991, %v515_v37 }
  0x43   :  { %v74_v39 = vfloor.f32 %v73_v36  ;;  %v145_v40 = vmul.f32 3.8197186, %v411_v38 }
  0x45   :  { %v444_v41 = vtrunc.f32 %v74_v39  ;;  %v146_v42 = vfloor.f32 %v145_v40 }
  0x47   :  { %v445_v43 = vcvt.f32.s32 %v444_v41  ;;  %v446_v44 = vtrunc.f32 %v146_v42 }
  0x49   :  { %vm76_vm6 = vcmp.gt.s32.totalorder %v445_v43, 0  ;;  %v447_v46 = vcvt.f32.s32 %v446_v44  ;;  %v426_v44 = vld [vmem:[%s696_s2 + $0xb8] sm:$0xff] }
  0x4a   :  { %v77_v45 = vsel %vm76_vm6, %v445_v43, 0  ;;  %v425_v43 = vld [vmem:[%s696_s2 + $0x38] sm:$0xff] }
  0x4b   :  { %vm78_vm7 = vcmp.lt.s32.totalorder %v77_v45, 14  ;;  %vm148_vm8 = vcmp.gt.s32.totalorder %v447_v46, 0 }
  0x4c   :  { %v527_v50 = vsel %vm78_vm7, %v77_v45, 14  ;;  %v149_v55 = vsel %vm148_vm8, %v447_v46, 0 }
  0x4d   :  { %v80_v54 = vcvt.s32.f32 %v527_v50  ;;  %vm167_vm9 = vcmp.eq.s32.totalorder %v527_v50, 1  ;;  %vm150_vm10 = vcmp.lt.s32.totalorder %v149_v55, 14  ;;  %vm181_vm11 = vcmp.eq.s32.totalorder %v527_v50, 2 }
  0x4e   :  { %v168_v56 = vsel %vm167_vm9, %v413_v48, %v156_v47  ;;  %v169_v57 = vsel %vm167_vm9, %v415_v49, %v413_v48  ;;  %v543_v59 = vsel %vm150_vm10, %v149_v55, 14  ;;  %v170_v60 = vsel %vm167_vm9, %v414_v52, %v412_v51 }
  0x4f   :  { %v171_v61 = vsel %vm167_vm9, %v416_v53, %v414_v52  ;;  %v81_v63 = vmul.f32 0.2617994, %v80_v54  ;;  %v152_v0 = vcvt.s32.f32 %v543_v59  ;;  %vm172_vm12 = vcmp.eq.s32.totalorder %v543_v59, 1 }
  0x50   :  { %v182_v1 = vsel %vm181_vm11, %v415_v49, %v168_v56  ;;  %v173_v2 = vsel %vm172_vm12, %v413_v48, %v156_v47  ;;  %v174_v3 = vsel %vm172_vm12, %v415_v49, %v413_v48  ;;  %v175_v4 = vsel %vm172_vm12, %v414_v52, %v412_v51  ;;  %v428_v51 = vld [vmem:[%s696_s2 + $0xc0] sm:$0xff] }
  0x51   :  { %v183_v5 = vsel %vm181_vm11, %v417_v58, %v169_v57  ;;  %v176_v6 = vsel %vm172_vm12, %v416_v53, %v414_v52  ;;  %v184_v7 = vsel %vm181_vm11, %v416_v53, %v170_v60  ;;  %v185_v8 = vsel %vm181_vm11, %v418_v62, %v171_v61 }
  0x52   :  { %vm186_vm13 = vcmp.eq.s32.totalorder %v543_v59, 2  ;;  %v558_v14 = vadd.f32 -0.3926991, %v81_v63  ;;  %vm195_vm14 = vcmp.eq.s32.totalorder %v527_v50, 3  ;;  %vm200_vm15 = vcmp.eq.s32.totalorder %v543_v59, 3 }
  0x53   :  { %v187_v11 = vsel %vm186_vm13, %v415_v49, %v173_v2  ;;  %v188_v12 = vsel %vm186_vm13, %v417_v58, %v174_v3  ;;  %v189_v13 = vsel %vm186_vm13, %v416_v53, %v175_v4  ;;  %v190_v15 = vsel %vm186_vm13, %v418_v62, %v176_v6  ;;  %v427_v49 = vld [vmem:[%s696_s2 + $0x40] sm:$0xff]  ;;  %v430_v2 = vld [vmem:[%s696_s2 + $0xc8] sm:$0xff] }
  0x54   :  { %v196_v16 = vsel %vm195_vm14, %v417_v58, %v182_v1  ;;  %v197_v17 = vsel %vm195_vm14, %v419_v9, %v183_v5  ;;  %v198_v18 = vsel %vm195_vm14, %v418_v62, %v184_v7  ;;  %v199_v19 = vsel %vm195_vm14, %v420_v10, %v185_v8  ;;  %v429_v1 = vld [vmem:[%s696_s2 + $0x48] sm:$0xff]  ;;  %v431_v7 = vld [vmem:[%s696_s2 + $0x50] sm:$0xff] }
  0x55   :  { %v568_v22 = vmul.f32 0.2617994, %v152_v0  ;;  %v201_v23 = vsel %vm200_vm15, %v417_v58, %v187_v11  ;;  %v202_v24 = vsel %vm200_vm15, %v419_v9, %v188_v12  ;;  %v203_v25 = vsel %vm200_vm15, %v418_v62, %v189_v13  ;;  %v432_v8 = vld [vmem:[%s696_s2 + $0xd0] sm:$0xff] }
  0x56   :  { %v204_v26 = vsel %vm200_vm15, %v420_v10, %v190_v15  ;;  %vm209_vm0 = vcmp.eq.s32.totalorder %v527_v50, 4  ;;  %vm214_vm1 = vcmp.eq.s32.totalorder %v543_v59, 4  ;;  %vm223_vm2 = vcmp.eq.s32.totalorder %v527_v50, 5 }
  0x57   :  { %v210_v29 = vsel %vm209_vm0, %v419_v9, %v196_v16  ;;  %v211_v30 = vsel %vm209_vm0, %v421_v20, %v197_v17  ;;  %v212_v31 = vsel %vm209_vm0, %v420_v10, %v198_v18  ;;  %v213_v32 = vsel %vm209_vm0, %v422_v21, %v199_v19 }
  0x58   :  { %v215_v34 = vsel %vm214_vm1, %v419_v9, %v201_v23  ;;  %v216_v35 = vsel %vm214_vm1, %v421_v20, %v202_v24  ;;  %v217_v36 = vsel %vm214_vm1, %v420_v10, %v203_v25  ;;  %v218_v38 = vsel %vm214_vm1, %v422_v21, %v204_v26  ;;  %v433_v23 = vld [vmem:[%s696_s2 + $0x58] sm:$0xff] }
  0x59   :  { %v224_v39 = vsel %vm223_vm2, %v421_v20, %v210_v29  ;;  %v225_v40 = vsel %vm223_vm2, %v423_v27, %v211_v30  ;;  %v226_v41 = vsel %vm223_vm2, %v422_v21, %v212_v31  ;;  %v227_v42 = vsel %vm223_vm2, %v424_v28, %v213_v32  ;;  %v434_v24 = vld [vmem:[%s696_s2 + $0xd8] sm:$0xff]  ;;  %v435_v29 = vld [vmem:[%s696_s2 + $0x60] sm:$0xff] }
  0x5a   :  { %vm228_vm3 = vcmp.eq.s32.totalorder %v543_v59, 5  ;;  %vm237_vm4 = vcmp.eq.s32.totalorder %v527_v50, 6  ;;  %vm242_vm5 = vcmp.eq.s32.totalorder %v543_v59, 6  ;;  %vm251_vm6 = vcmp.eq.s32.totalorder %v527_v50, 7  ;;  %v436_v30 = vld [vmem:[%s696_s2 + $0xe0] sm:$0xff] }
  0x5b   :  { %v229_v45 = vsel %vm228_vm3, %v421_v20, %v215_v34  ;;  %v230_v46 = vsel %vm228_vm3, %v423_v27, %v216_v35  ;;  %v231_v47 = vsel %vm228_vm3, %v422_v21, %v217_v36  ;;  %v232_v48 = vsel %vm228_vm3, %v424_v28, %v218_v38 }
  0x5c   :  { %v238_v52 = vsel %vm237_vm4, %v423_v27, %v224_v39  ;;  %v239_v53 = vsel %vm237_vm4, %v425_v43, %v225_v40  ;;  %v240_v54 = vsel %vm237_vm4, %v424_v28, %v226_v41  ;;  %v241_v55 = vsel %vm237_vm4, %v426_v44, %v227_v42 }
  0x5d   :  { %v243_v56 = vsel %vm242_vm5, %v423_v27, %v229_v45  ;;  %v244_v57 = vsel %vm242_vm5, %v425_v43, %v230_v46  ;;  %v245_v58 = vsel %vm242_vm5, %v424_v28, %v231_v47  ;;  %v246_v60 = vsel %vm242_vm5, %v426_v44, %v232_v48  ;;  %v437_v45 = vld [vmem:[%s696_s2 + $0x68] sm:$0xff] }
  0x5e   :  { %v252_v61 = vsel %vm251_vm6, %v425_v43, %v238_v52  ;;  %v253_v62 = vsel %vm251_vm6, %v427_v49, %v239_v53  ;;  %v254_v63 = vsel %vm251_vm6, %v426_v44, %v240_v54  ;;  %v255_v0 = vsel %vm251_vm6, %v428_v51, %v241_v55  ;;  %v438_v46 = vld [vmem:[%s696_s2 + $0xe8] sm:$0xff]  ;;  %v439_v52 = vld [vmem:[%s696_s2 + $0x70] sm:$0xff] }
  0x5f   :  { %vm256_vm7 = vcmp.eq.s32.totalorder %v543_v59, 7  ;;  %vm265_vm8 = vcmp.eq.s32.totalorder %v527_v50, 8  ;;  %vm270_vm9 = vcmp.eq.s32.totalorder %v543_v59, 8  ;;  %vm279_vm10 = vcmp.eq.s32.totalorder %v527_v50, 9  ;;  %v440_v53 = vld [vmem:[%s696_s2 + $0xf0] sm:$0xff] }
  0x60   :  { %v257_v3 = vsel %vm256_vm7, %v425_v43, %v243_v56  ;;  %v258_v4 = vsel %vm256_vm7, %v427_v49, %v244_v57  ;;  %v259_v5 = vsel %vm256_vm7, %v426_v44, %v245_v58  ;;  %v260_v6 = vsel %vm256_vm7, %v428_v51, %v246_v60 }
  0x61   :  { %v266_v9 = vsel %vm265_vm8, %v427_v49, %v252_v61  ;;  %v267_v10 = vsel %vm265_vm8, %v429_v1, %v253_v62  ;;  %v268_v11 = vsel %vm265_vm8, %v428_v51, %v254_v63  ;;  %v269_v12 = vsel %vm265_vm8, %v430_v2, %v255_v0 }
  0x62   :  { %v271_v13 = vsel %vm270_vm9, %v427_v49, %v257_v3  ;;  %v272_v15 = vsel %vm270_vm9, %v429_v1, %v258_v4  ;;  %v273_v16 = vsel %vm270_vm9, %v428_v51, %v259_v5  ;;  %v274_v17 = vsel %vm270_vm9, %v430_v2, %v260_v6  ;;  %v441_v3 = vld [vmem:[%s696_s2 + $0x78] sm:$0xff] }
  0x63   :  { %v280_v18 = vsel %vm279_vm10, %v429_v1, %v266_v9  ;;  %v281_v19 = vsel %vm279_vm10, %v431_v7, %v267_v10  ;;  %v282_v20 = vsel %vm279_vm10, %v430_v2, %v268_v11  ;;  %v283_v21 = vsel %vm279_vm10, %v432_v8, %v269_v12  ;;  %v442_v4 = vld [vmem:[%s696_s2 + $0xf8] sm:$0xff] }
  0x64   :  { %vm284_vm11 = vcmp.eq.s32.totalorder %v543_v59, 9  ;;  %vm293_vm12 = vcmp.eq.s32.totalorder %v527_v50, 10  ;;  %vm298_vm13 = vcmp.eq.s32.totalorder %v543_v59, 10  ;;  %vm307_vm14 = vcmp.eq.s32.totalorder %v527_v50, 11 }
  0x65   :  { %v285_v25 = vsel %vm284_vm11, %v429_v1, %v271_v13  ;;  %v286_v26 = vsel %vm284_vm11, %v431_v7, %v272_v15  ;;  %v287_v27 = vsel %vm284_vm11, %v430_v2, %v273_v16  ;;  %v288_v28 = vsel %vm284_vm11, %v432_v8, %v274_v17 }
  0x66   :  { %v294_v31 = vsel %vm293_vm12, %v431_v7, %v280_v18  ;;  %v295_v32 = vsel %vm293_vm12, %v433_v23, %v281_v19  ;;  %v296_v34 = vsel %vm293_vm12, %v432_v8, %v282_v20  ;;  %v297_v35 = vsel %vm293_vm12, %v434_v24, %v283_v21 }
  0x67   :  { %v299_v36 = vsel %vm298_vm13, %v431_v7, %v285_v25  ;;  %v300_v38 = vsel %vm298_vm13, %v433_v23, %v286_v26  ;;  %v301_v39 = vsel %vm298_vm13, %v432_v8, %v287_v27  ;;  %v302_v40 = vsel %vm298_vm13, %v434_v24, %v288_v28 }
  0x68   :  { %v308_v41 = vsel %vm307_vm14, %v433_v23, %v294_v31  ;;  %v309_v42 = vsel %vm307_vm14, %v435_v29, %v295_v32  ;;  %v310_v43 = vsel %vm307_vm14, %v434_v24, %v296_v34  ;;  %v311_v44 = vsel %vm307_vm14, %v436_v30, %v297_v35 }
  0x69   :  { %vm312_vm15 = vcmp.eq.s32.totalorder %v543_v59, 11  ;;  %vm321_vm0 = vcmp.eq.s32.totalorder %v527_v50, 12  ;;  %vm326_vm1 = vcmp.eq.s32.totalorder %v543_v59, 12  ;;  %vm335_vm2 = vcmp.eq.s32.totalorder %v527_v50, 13 }
  0x6a   :  { %v313_v47 = vsel %vm312_vm15, %v433_v23, %v299_v36  ;;  %v314_v48 = vsel %vm312_vm15, %v435_v29, %v300_v38  ;;  %v315_v49 = vsel %vm312_vm15, %v434_v24, %v301_v39  ;;  %v316_v51 = vsel %vm312_vm15, %v436_v30, %v302_v40 }
  0x6b   :  { %v322_v54 = vsel %vm321_vm0, %v435_v29, %v308_v41  ;;  %v323_v55 = vsel %vm321_vm0, %v437_v45, %v309_v42  ;;  %v324_v56 = vsel %vm321_vm0, %v436_v30, %v310_v43  ;;  %v325_v57 = vsel %vm321_vm0, %v438_v46, %v311_v44 }
  0x6c   :  { %v327_v58 = vsel %vm326_vm1, %v435_v29, %v313_v47  ;;  %v328_v60 = vsel %vm326_vm1, %v437_v45, %v314_v48  ;;  %v329_v61 = vsel %vm326_vm1, %v436_v30, %v315_v49  ;;  %v330_v62 = vsel %vm326_vm1, %v438_v46, %v316_v51 }
  0x6d   :  { %v336_v63 = vsel %vm335_vm2, %v437_v45, %v322_v54  ;;  %v337_v0 = vsel %vm335_vm2, %v439_v52, %v323_v55  ;;  %v338_v1 = vsel %vm335_vm2, %v438_v46, %v324_v56  ;;  %v339_v2 = vsel %vm335_vm2, %v440_v53, %v325_v57 }
  0x6e   :  { %v154_v5 = vadd.f32 -0.3926991, %v568_v22  ;;  %vm340_vm3 = vcmp.eq.s32.totalorder %v543_v59, 13  ;;  %vm349_vm4 = vcmp.eq.s32.totalorder %v527_v50, 14  ;;  %vm354_vm5 = vcmp.eq.s32.totalorder %v543_v59, 14 }
  0x6f   :  { %v341_v6 = vsel %vm340_vm3, %v437_v45, %v327_v58  ;;  %v342_v7 = vsel %vm340_vm3, %v439_v52, %v328_v60  ;;  %v343_v8 = vsel %vm340_vm3, %v438_v46, %v329_v61  ;;  %v344_v9 = vsel %vm340_vm3, %v440_v53, %v330_v62 }
  0x70   :  { %v350_v10 = vsel %vm349_vm4, %v439_v52, %v336_v63  ;;  %v351_v11 = vsel %vm349_vm4, %v441_v3, %v337_v0  ;;  %v352_v12 = vsel %vm349_vm4, %v440_v53, %v338_v1  ;;  %v353_v13 = vsel %vm349_vm4, %v442_v4, %v339_v2 }
  0x71   :  { %v355_v15 = vsel %vm354_vm5, %v439_v52, %v341_v6  ;;  %v356_v16 = vsel %vm354_vm5, %v441_v3, %v342_v7  ;;  %v357_v17 = vsel %vm354_vm5, %v440_v53, %v343_v8  ;;  %v358_v18 = vsel %vm354_vm5, %v442_v4, %v344_v9 }
  0x72   :  { %v83_v22 = vsub.f32 %v512_v33, %v558_v14  ;;  %v360_v19 = vsub.f32 %v353_v13, %v352_v12  ;;  %v362_v20 = vsub.f32 %v351_v11, %v350_v10  ;;  %v364_v50 = vmul.f32 2.0, %v352_v12 }
  0x73   :  { %v155_v59 = vsub.f32 %v515_v37, %v154_v5  ;;  %v376_v21 = vsub.f32 %v358_v18, %v357_v17  ;;  %v378_v23 = vsub.f32 %v356_v16, %v355_v15  ;;  %v380_v24 = vmul.f32 2.0, %v357_v17 }
  0x74   :  { %v359_v25 = vmul.f32 0.5, %v352_v12  ;;  %v361_v26 = vmul.f32 0.63661975, %v360_v19  ;;  %v363_v27 = vmul.f32 3.8197186, %v362_v20  ;;  %v365_v28 = vadd.f32 %v364_v50, %v353_v13 }
  0x75   :  { %v375_v29 = vmul.f32 0.5, %v357_v17  ;;  %v377_v30 = vmul.f32 0.63661975, %v376_v21  ;;  %v379_v31 = vmul.f32 3.8197186, %v378_v23  ;;  %v381_v32 = vadd.f32 %v380_v24, %v358_v18 }
  0x76   :  { %v366_v34 = vmul.f32 0.04363323, %v365_v28  ;;  %v368_v35 = vmul.f32 %v361_v26, %v83_v22 }
  0x77   :  { %v382_v36 = vmul.f32 0.04363323, %v381_v32  ;;  %v384_v33 = vmul.f32 %v377_v30, %v155_v59 }
  0x78   :  { %v367_v14 = vsub.f32 %v363_v27, %v366_v34  ;;  %v369_v38 = vadd.f32 %v368_v35, %v359_v25 }
  0x79   :  { %v383_v39 = vsub.f32 %v379_v31, %v382_v36  ;;  %v385_v40 = vadd.f32 %v384_v33, %v375_v29 }
  0x7a   :  { %v370_v37 = vmul.f32 %v369_v38, %v83_v22 }
  0x7b   :  { %v386_v41 = vmul.f32 %v385_v40, %v155_v59 }
  0x7c   :  { %v371_v42 = vadd.f32 %v370_v37, %v367_v14 }
  0x7d   :  { %v387_v43 = vadd.f32 %v386_v41, %v383_v39 }
  0x7e   :  { %v372_v44 = vmul.f32 %v371_v42, %v83_v22 }
  0x7f   :  { %v388_v45 = vmul.f32 %v387_v43, %v155_v59 }
  0x80   :  { %v373_v46 = vadd.f32 %v372_v44, %v350_v10 }
  0x81   :  { %v389_v47 = vadd.f32 %v388_v45, %v355_v15 }
  0x82   :  { %391 = vst [vmem:[%s697_s3] sm:$0xff] %v373_v46 }
  0x83   :  { %443 = vst [vmem:[%s697_s3 + $0x8] sm:$0xff] %v389_v47 }

</bundles_post_ra>
